<compile_context>
chip_gen: v5e
topology: v5e:2x2
jax: 0.10.0
libtpu: 0.0.40
codegen_flags: <defaults>
</compile_context>

<pallas_src>
import functools

import jax
import jax.numpy as jnp
from jax import lax
from jax.experimental import pallas as pl
from jax.experimental.pallas import tpu as pltpu

SELU_ALPHA = 1.6732632423543772848170429916717
SELU_SCALE = 1.0507009873554804934193349852946
BN_EPS = 1e-5


def _selu(x):
    # exp only sees the non-positive branch values -> no inf/NaN risk.
    return SELU_SCALE * jnp.where(
        x > 0, x, SELU_ALPHA * (jnp.exp(jnp.minimum(x, 0.0)) - 1.0))


def _bn_train_fold(y, gamma, beta, mask, inv_count):
    """Training-mode BatchNorm folded to y*scale + shift (per channel row).

    Stats are taken over the masked interior pixels only (two-pass variance).
    The conv bias is omitted upstream: (y+b) - mean(y+b) == y - mean(y).
    """
    ym = y * mask
    mean = jnp.sum(ym, axis=1, keepdims=True) * inv_count
    d = (y - mean) * mask
    var = jnp.sum(d * d, axis=1, keepdims=True) * inv_count
    scale = gamma * lax.rsqrt(var + BN_EPS)
    shift = beta - mean * scale
    return y * scale + shift


def _stack_taps(x, stack_ref, *, c, wp, p_pad):
    """Write the 9 lane-rolled 3x3-tap views of x into the (9*C, P) scratch.

    x: (C, P) activation; channels on sublanes, flattened zero-padded pixels
    on lanes.  Row block k of the scratch holds x shifted by tap offset k.
    """
    for k in range(9):
        dy, dx = k // 3 - 1, k % 3 - 1
        s = dy * wp + dx                       # lane offset of this tap
        xs = x if s == 0 else pltpu.roll(x, shift=(-s) % p_pad, axis=1)
        stack_ref[pl.ds(k * c, c), :] = xs


def resblock_kernel(x_ref, w_ref, bn_ref, mask_ref, o_ref, stack_ref,
                    *, c, wp, p_pad, inv_count):
    x = x_ref[...]                 # (C, P) padded, transposed, zero ring/tail
    mask = mask_ref[...]           # (1, P) interior-pixel mask
    bn = bn_ref[...]               # (C, 4) = [g1 | be1 | g2 | be2]

    # ---- conv1: one K=9*C MXU contraction over the rolled tap stack ----
    _stack_taps(x, stack_ref, c=c, wp=wp, p_pad=p_pad)
    y1 = jnp.dot(w_ref[0], stack_ref[...], preferred_element_type=jnp.float32)

    # BN1 -> SELU; re-mask so conv2 sees correct zero padding / zero lane tail.
    h1 = _selu(_bn_train_fold(y1, bn[:, 0:1], bn[:, 1:2], mask, inv_count)) * mask

    # ---- conv2 (reuses the same stacking scratch) ----
    _stack_taps(h1, stack_ref, c=c, wp=wp, p_pad=p_pad)
    y2 = jnp.dot(w_ref[1], stack_ref[...], preferred_element_type=jnp.float32)

    # BN2 -> residual add -> SELU.
    o_ref[...] = _selu(
        _bn_train_fold(y2, bn[:, 2:3], bn[:, 3:4], mask, inv_count) + x)


def _full_spec(shape):
    nd = len(shape)
    return pl.BlockSpec(shape, lambda i, _nd=nd: (0,) * _nd)


# ---------------------------------------------------------------------------
# Layout helpers: (N,C,H,W) <-> lane-dense (C, P_pad) padded-transposed layout.
# For a residual *tower* these run once at the tower boundary; every block's
# pallas_call consumes and produces (C, P_pad) directly.
# ---------------------------------------------------------------------------
def _lane_dims(n, h, w):
    hp, wp = h + 2, w + 2
    p_real = n * hp * wp
    p_pad = ((p_real + 127) // 128) * 128
    return hp, wp, p_real, p_pad


def nchw_to_lane_packed(x_nchw):
    n, c, h, w = x_nchw.shape
    _, _, p_real, p_pad = _lane_dims(n, h, w)
    xt = jnp.transpose(x_nchw.astype(jnp.float32), (1, 0, 2, 3))   # (C,N,H,W)
    xt = jnp.pad(xt, ((0, 0), (0, 0), (1, 1), (1, 1)))             # (C,N,Hp,Wp)
    return jnp.pad(xt.reshape(c, p_real), ((0, 0), (0, p_pad - p_real)))


def lane_packed_to_nchw(xt, n, c, h, w):
    hp, wp, p_real, _ = _lane_dims(n, h, w)
    out = xt[:, :p_real].reshape(c, n, hp, wp)[:, :, 1:h + 1, 1:w + 1]
    return jnp.transpose(out, (1, 0, 2, 3))


def _interior_mask(n, h, w):
    hp, wp, p_real, p_pad = _lane_dims(n, h, w)
    pos = jnp.arange(p_pad, dtype=jnp.int32)
    rem = pos % (hp * wp)
    yy, xx = rem // wp, rem % wp
    interior = (pos < p_real) & (yy >= 1) & (yy <= h) & (xx >= 1) & (xx <= w)
    return interior.astype(jnp.float32).reshape(1, p_pad)


def pack_block_params(params, c):
    """Pack conv taps into (2, C, 9*C) and BN affines into (C, 4)."""
    def taps(w):  # (O, I, 3, 3) -> (O, 9*I) with column index k*I + i
        return jnp.transpose(w.astype(jnp.float32), (0, 2, 3, 1)).reshape(c, 9 * c)

    w_packed = jnp.stack([taps(params["w1"]), taps(params["w2"])], axis=0)
    bn_packed = jnp.stack(
        [params["g1"], params["be1"], params["g2"], params["be2"]],
        axis=1).astype(jnp.float32)                                  # (C, 4)
    # Conv biases b1/b2 intentionally NOT packed: training-mode BN cancels them.
    return w_packed, bn_packed


def resblock_lane_packed(xt, w_packed, bn_packed, mask, *, n, h, w):
    """Fused residual block on the (C, P_pad) lane-dense layout."""
    c, p_pad = xt.shape
    _, wp, _, _ = _lane_dims(n, h, w)
    kernel = functools.partial(
        resblock_kernel, c=c, wp=wp, p_pad=p_pad, inv_count=1.0 / (n * h * w))
    return pl.pallas_call(
        kernel,
        out_shape=jax.ShapeDtypeStruct((c, p_pad), jnp.float32),
        grid=(1,),
        in_specs=[
            _full_spec((c, p_pad)),       # x (padded, transposed)
            _full_spec((2, c, 9 * c)),    # conv1/conv2 tap matrices
            _full_spec((c, 4)),           # BN affine params (g1,be1,g2,be2)
            _full_spec((1, p_pad)),       # interior-pixel mask
        ],
        out_specs=_full_spec((c, p_pad)),
        scratch_shapes=[pltpu.VMEM((9 * c, p_pad), jnp.float32)],
        compiler_params=pltpu.CompilerParams(
            dimension_semantics=("arbitrary",)),
    )(xt, w_packed, bn_packed, mask)


@jax.jit
def residual_block_forward(x_nchw, params):
    n, c, h, w = x_nchw.shape
    xt = nchw_to_lane_packed(x_nchw)
    w_packed, bn_packed = pack_block_params(params, c)
    mask = _interior_mask(n, h, w)
    out = resblock_lane_packed(xt, w_packed, bn_packed, mask, n=n, h=h, w=w)
    return lane_packed_to_nchw(out, n, c, h, w)


def ref_forward(x, params):
    """Pure-JAX reference matching the PyTorch training-mode forward."""
    def conv(x, wgt, b):
        y = lax.conv_general_dilated(
            x, wgt, window_strides=(1, 1), padding=((1, 1), (1, 1)),
            dimension_numbers=("NCHW", "OIHW", "NCHW"))
        return y + b[None, :, None, None]

    def bn(y, g, be):
        mean = jnp.mean(y, axis=(0, 2, 3), keepdims=True)
        var = jnp.mean((y - mean) ** 2, axis=(0, 2, 3), keepdims=True)
        return ((y - mean) / jnp.sqrt(var + BN_EPS)) * g[None, :, None, None] \
            + be[None, :, None, None]

    h = jax.nn.selu(bn(conv(x, params["w1"], params["b1"]),
                       params["g1"], params["be1"]))
    h2 = bn(conv(h, params["w2"], params["b2"]),
            params["g2"], params["be2"]) + x
    return jax.nn.selu(h2)


if __name__ == "__main__":
    # Small shapes: batch=2, hidden_size=32 channels, 8x8 board.
    N, C, H, W = 2, 32, 8, 8

    key = jax.random.PRNGKey(0)
    k_x, k_w1, k_b1, k_w2, k_b2 = jax.random.split(key, 5)

    x = jax.random.normal(k_x, (N, C, H, W), dtype=jnp.float32)
    params = {
        "w1": 0.1 * jax.random.normal(k_w1, (C, C, 3, 3), dtype=jnp.float32),
        "b1": 0.1 * jax.random.normal(k_b1, (C,), dtype=jnp.float32),
        "w2": 0.1 * jax.random.normal(k_w2, (C, C, 3, 3), dtype=jnp.float32),
        "b2": 0.1 * jax.random.normal(k_b2, (C,), dtype=jnp.float32),
        # BatchNorm2d default init: weight=1, bias=0
        "g1": jnp.ones((C,), jnp.float32),
        "be1": jnp.zeros((C,), jnp.float32),
        "g2": jnp.ones((C,), jnp.float32),
        "be2": jnp.zeros((C,), jnp.float32),
    }

    out = jax.block_until_ready(residual_block_forward(x, params))
    ref = jax.block_until_ready(ref_forward(x, params))

    assert out.shape == (N, C, H, W)
    if not jnp.allclose(out, ref, atol=1e-4, rtol=1e-4):
        raise AssertionError("Pallas kernel output mismatch vs JAX reference")

    print("KERNEL_OK")
</pallas_src>

<mosaic_0001>
module attributes {stable_mosaic.version = 11 : i64} {
  func.func @resblock_kernel(%arg0: i32, %arg1: memref<32x256xf32, #tpu.memory_space<vmem>>, %arg2: memref<2x32x288xf32, #tpu.memory_space<vmem>>, %arg3: memref<32x4xf32, #tpu.memory_space<vmem>>, %arg4: memref<1x256xf32, #tpu.memory_space<vmem>>, %arg5: memref<32x256xf32, #tpu.memory_space<vmem>>, %arg6: memref<288x256xf32, #tpu.memory_space<vmem>>) attributes {dimension_semantics = [#tpu.dimension_semantics<arbitrary>], iteration_bounds = array<i64: 1>, scalar_prefetch = 0 : i64, scratch_operands = 1 : i64, tpu.core_type = #tpu.core_type<tc>, window_params = [{pipeline_mode = #tpu.pipeline_mode<synchronous>, transform_indices = @transform_0, window_bounds = array<i64: 32, 256>}, {pipeline_mode = #tpu.pipeline_mode<synchronous>, transform_indices = @transform_1, window_bounds = array<i64: 2, 32, 288>}, {pipeline_mode = #tpu.pipeline_mode<synchronous>, transform_indices = @transform_2, window_bounds = array<i64: 32, 4>}, {pipeline_mode = #tpu.pipeline_mode<synchronous>, transform_indices = @transform_3, window_bounds = array<i64: 1, 256>}, {pipeline_mode = #tpu.pipeline_mode<synchronous>, transform_indices = @transform_4, window_bounds = array<i64: 32, 256>}]} {
    %c0 = arith.constant 0 : index
    %c0_0 = arith.constant 0 : index
    %0 = vector.load %arg1[%c0, %c0_0] : memref<32x256xf32, #tpu.memory_space<vmem>>, vector<32x256xf32>
    %c0_1 = arith.constant 0 : index
    %c0_2 = arith.constant 0 : index
    %1 = vector.load %arg4[%c0_1, %c0_2] : memref<1x256xf32, #tpu.memory_space<vmem>>, vector<1x256xf32>
    %c0_3 = arith.constant 0 : index
    %c0_4 = arith.constant 0 : index
    %2 = vector.load %arg3[%c0_3, %c0_4] : memref<32x4xf32, #tpu.memory_space<vmem>>, vector<32x4xf32>
    %c11_i32 = arith.constant 11 : i32
    %3 = tpu.dynamic_rotate %0 by %c11_i32 dim 1 : vector<32x256xf32>, i32 -> vector<32x256xf32>
    %c0_5 = arith.constant 0 : index
    %c0_6 = arith.constant 0 : index
    %4 = vector.load %arg6[%c0_5, %c0_6] : memref<288x256xf32, #tpu.memory_space<vmem>>, vector<32x256xf32>
    tpu.vector_store %arg6[%c0_5, %c0_6], %3 {strides = array<i32>} : memref<288x256xf32, #tpu.memory_space<vmem>>, vector<32x256xf32>,
    %c10_i32 = arith.constant 10 : i32
    %5 = tpu.dynamic_rotate %0 by %c10_i32 dim 1 : vector<32x256xf32>, i32 -> vector<32x256xf32>
    %c32 = arith.constant 32 : index
    %c0_7 = arith.constant 0 : index
    %6 = vector.load %arg6[%c32, %c0_7] : memref<288x256xf32, #tpu.memory_space<vmem>>, vector<32x256xf32>
    tpu.vector_store %arg6[%c32, %c0_7], %5 {strides = array<i32>} : memref<288x256xf32, #tpu.memory_space<vmem>>, vector<32x256xf32>,
    %c9_i32 = arith.constant 9 : i32
    %7 = tpu.dynamic_rotate %0 by %c9_i32 dim 1 : vector<32x256xf32>, i32 -> vector<32x256xf32>
    %c64 = arith.constant 64 : index
    %c0_8 = arith.constant 0 : index
    %8 = vector.load %arg6[%c64, %c0_8] : memref<288x256xf32, #tpu.memory_space<vmem>>, vector<32x256xf32>
    tpu.vector_store %arg6[%c64, %c0_8], %7 {strides = array<i32>} : memref<288x256xf32, #tpu.memory_space<vmem>>, vector<32x256xf32>,
    %c1_i32 = arith.constant 1 : i32
    %9 = tpu.dynamic_rotate %0 by %c1_i32 dim 1 : vector<32x256xf32>, i32 -> vector<32x256xf32>
    %c96 = arith.constant 96 : index
    %c0_9 = arith.constant 0 : index
    %10 = vector.load %arg6[%c96, %c0_9] : memref<288x256xf32, #tpu.memory_space<vmem>>, vector<32x256xf32>
    tpu.vector_store %arg6[%c96, %c0_9], %9 {strides = array<i32>} : memref<288x256xf32, #tpu.memory_space<vmem>>, vector<32x256xf32>,
    %c128 = arith.constant 128 : index
    %c0_10 = arith.constant 0 : index
    %11 = vector.load %arg6[%c128, %c0_10] : memref<288x256xf32, #tpu.memory_space<vmem>>, vector<32x256xf32>
    tpu.vector_store %arg6[%c128, %c0_10], %0 {strides = array<i32>} : memref<288x256xf32, #tpu.memory_space<vmem>>, vector<32x256xf32>,
    %c255_i32 = arith.constant 255 : i32
    %12 = tpu.dynamic_rotate %0 by %c255_i32 dim 1 : vector<32x256xf32>, i32 -> vector<32x256xf32>
    %c160 = arith.constant 160 : index
    %c0_11 = arith.constant 0 : index
    %13 = vector.load %arg6[%c160, %c0_11] : memref<288x256xf32, #tpu.memory_space<vmem>>, vector<32x256xf32>
    tpu.vector_store %arg6[%c160, %c0_11], %12 {strides = array<i32>} : memref<288x256xf32, #tpu.memory_space<vmem>>, vector<32x256xf32>,
    %c247_i32 = arith.constant 247 : i32
    %14 = tpu.dynamic_rotate %0 by %c247_i32 dim 1 : vector<32x256xf32>, i32 -> vector<32x256xf32>
    %c192 = arith.constant 192 : index
    %c0_12 = arith.constant 0 : index
    %15 = vector.load %arg6[%c192, %c0_12] : memref<288x256xf32, #tpu.memory_space<vmem>>, vector<32x256xf32>
    tpu.vector_store %arg6[%c192, %c0_12], %14 {strides = array<i32>} : memref<288x256xf32, #tpu.memory_space<vmem>>, vector<32x256xf32>,
    %c246_i32 = arith.constant 246 : i32
    %16 = tpu.dynamic_rotate %0 by %c246_i32 dim 1 : vector<32x256xf32>, i32 -> vector<32x256xf32>
    %c224 = arith.constant 224 : index
    %c0_13 = arith.constant 0 : index
    %17 = vector.load %arg6[%c224, %c0_13] : memref<288x256xf32, #tpu.memory_space<vmem>>, vector<32x256xf32>
    tpu.vector_store %arg6[%c224, %c0_13], %16 {strides = array<i32>} : memref<288x256xf32, #tpu.memory_space<vmem>>, vector<32x256xf32>,
    %c245_i32 = arith.constant 245 : i32
    %18 = tpu.dynamic_rotate %0 by %c245_i32 dim 1 : vector<32x256xf32>, i32 -> vector<32x256xf32>
    %c256 = arith.constant 256 : index
    %c0_14 = arith.constant 0 : index
    %19 = vector.load %arg6[%c256, %c0_14] : memref<288x256xf32, #tpu.memory_space<vmem>>, vector<32x256xf32>
    tpu.vector_store %arg6[%c256, %c0_14], %18 {strides = array<i32>} : memref<288x256xf32, #tpu.memory_space<vmem>>, vector<32x256xf32>,
    %c0_15 = arith.constant 0 : index
    %c0_16 = arith.constant 0 : index
    %c0_17 = arith.constant 0 : index
    %20 = vector.load %arg2[%c0_15, %c0_16, %c0_17] : memref<2x32x288xf32, #tpu.memory_space<vmem>>, vector<1x32x288xf32>
    %21 = vector.shape_cast %20 : vector<1x32x288xf32> to vector<32x288xf32>
    %c0_18 = arith.constant 0 : index
    %c0_19 = arith.constant 0 : index
    %22 = vector.load %arg6[%c0_18, %c0_19] : memref<288x256xf32, #tpu.memory_space<vmem>>, vector<288x256xf32>
    %cst = arith.constant dense<0.000000e+00> : vector<32x256xf32>
    %23 = tpu.matmul %21, %22, %cst {dimension_numbers = #tpu.dot_dimension_numbers<[1], [0], [0], [1], [0, 0, 1, 1], [], []>} : vector<32x288xf32>, vector<288x256xf32>, vector<32x256xf32> -> vector<32x256xf32>
    %24 = vector.extract_strided_slice %2 {offsets = [0, 0], sizes = [32, 1], strides = [1, 1]} : vector<32x4xf32> to vector<32x1xf32>
    %25 = vector.extract_strided_slice %2 {offsets = [0, 1], sizes = [32, 1], strides = [1, 1]} : vector<32x4xf32> to vector<32x1xf32>
    %26 = vector.broadcast %1 : vector<1x256xf32> to vector<32x256xf32>
    %27 = arith.mulf %23, %26 : vector<32x256xf32>
    %cst_20 = arith.constant dense<0.000000e+00> : vector<32xf32>
    %28 = vector.multi_reduction <add>, %27, %cst_20 [1] : vector<32x256xf32> to vector<32xf32>
    %29 = vector.shape_cast %28 : vector<32xf32> to vector<32x1xf32>
    %cst_21 = arith.constant 7.812500e-03 : f32
    %30 = vector.broadcast %cst_21 : f32 to vector<32x1xf32>
    %31 = arith.mulf %29, %30 : vector<32x1xf32>
    %32 = vector.broadcast %31 : vector<32x1xf32> to vector<32x256xf32>
    %33 = arith.subf %23, %32 : vector<32x256xf32>
    %34 = vector.broadcast %1 : vector<1x256xf32> to vector<32x256xf32>
    %35 = arith.mulf %33, %34 : vector<32x256xf32>
    %36 = arith.mulf %35, %35 : vector<32x256xf32>
    %cst_22 = arith.constant dense<0.000000e+00> : vector<32xf32>
    %37 = vector.multi_reduction <add>, %36, %cst_22 [1] : vector<32x256xf32> to vector<32xf32>
    %38 = vector.shape_cast %37 : vector<32xf32> to vector<32x1xf32>
    %cst_23 = arith.constant 7.812500e-03 : f32
    %39 = vector.broadcast %cst_23 : f32 to vector<32x1xf32>
    %40 = arith.mulf %38, %39 : vector<32x1xf32>
    %cst_24 = arith.constant 9.99999974E-6 : f32
    %41 = vector.broadcast %cst_24 : f32 to vector<32x1xf32>
    %42 = arith.addf %40, %41 : vector<32x1xf32>
    %43 = math.rsqrt %42 : vector<32x1xf32>
    %44 = arith.mulf %24, %43 : vector<32x1xf32>
    %45 = arith.mulf %31, %44 : vector<32x1xf32>
    %46 = arith.subf %25, %45 : vector<32x1xf32>
    %47 = vector.broadcast %44 : vector<32x1xf32> to vector<32x256xf32>
    %48 = arith.mulf %23, %47 : vector<32x256xf32>
    %49 = vector.broadcast %46 : vector<32x1xf32> to vector<32x256xf32>
    %50 = arith.addf %48, %49 : vector<32x256xf32>
    %cst_25 = arith.constant 0.000000e+00 : f32
    %51 = vector.broadcast %cst_25 : f32 to vector<32x256xf32>
    %52 = arith.cmpf ogt, %50, %51 : vector<32x256xf32>
    %cst_26 = arith.constant 0.000000e+00 : f32
    %53 = vector.broadcast %cst_26 : f32 to vector<32x256xf32>
    %54 = arith.minimumf %50, %53 : vector<32x256xf32>
    %55 = math.exp %54 : vector<32x256xf32>
    %cst_27 = arith.constant 1.000000e+00 : f32
    %56 = vector.broadcast %cst_27 : f32 to vector<32x256xf32>
    %57 = arith.subf %55, %56 : vector<32x256xf32>
    %cst_28 = arith.constant 1.67326319 : f32
    %58 = vector.broadcast %cst_28 : f32 to vector<32x256xf32>
    %59 = arith.mulf %58, %57 : vector<32x256xf32>
    %60 = arith.select %52, %50, %59 : vector<32x256xi1>, vector<32x256xf32>
    %cst_29 = arith.constant 1.05070102 : f32
    %61 = vector.broadcast %cst_29 : f32 to vector<32x256xf32>
    %62 = arith.mulf %61, %60 : vector<32x256xf32>
    %63 = vector.broadcast %1 : vector<1x256xf32> to vector<32x256xf32>
    %64 = arith.mulf %62, %63 : vector<32x256xf32>
    %c11_i32_30 = arith.constant 11 : i32
    %65 = tpu.dynamic_rotate %64 by %c11_i32_30 dim 1 : vector<32x256xf32>, i32 -> vector<32x256xf32>
    %c0_31 = arith.constant 0 : index
    %c0_32 = arith.constant 0 : index
    %66 = vector.load %arg6[%c0_31, %c0_32] : memref<288x256xf32, #tpu.memory_space<vmem>>, vector<32x256xf32>
    tpu.vector_store %arg6[%c0_31, %c0_32], %65 {strides = array<i32>} : memref<288x256xf32, #tpu.memory_space<vmem>>, vector<32x256xf32>,
    %c10_i32_33 = arith.constant 10 : i32
    %67 = tpu.dynamic_rotate %64 by %c10_i32_33 dim 1 : vector<32x256xf32>, i32 -> vector<32x256xf32>
    %c32_34 = arith.constant 32 : index
    %c0_35 = arith.constant 0 : index
    %68 = vector.load %arg6[%c32_34, %c0_35] : memref<288x256xf32, #tpu.memory_space<vmem>>, vector<32x256xf32>
    tpu.vector_store %arg6[%c32_34, %c0_35], %67 {strides = array<i32>} : memref<288x256xf32, #tpu.memory_space<vmem>>, vector<32x256xf32>,
    %c9_i32_36 = arith.constant 9 : i32
    %69 = tpu.dynamic_rotate %64 by %c9_i32_36 dim 1 : vector<32x256xf32>, i32 -> vector<32x256xf32>
    %c64_37 = arith.constant 64 : index
    %c0_38 = arith.constant 0 : index
    %70 = vector.load %arg6[%c64_37, %c0_38] : memref<288x256xf32, #tpu.memory_space<vmem>>, vector<32x256xf32>
    tpu.vector_store %arg6[%c64_37, %c0_38], %69 {strides = array<i32>} : memref<288x256xf32, #tpu.memory_space<vmem>>, vector<32x256xf32>,
    %c1_i32_39 = arith.constant 1 : i32
    %71 = tpu.dynamic_rotate %64 by %c1_i32_39 dim 1 : vector<32x256xf32>, i32 -> vector<32x256xf32>
    %c96_40 = arith.constant 96 : index
    %c0_41 = arith.constant 0 : index
    %72 = vector.load %arg6[%c96_40, %c0_41] : memref<288x256xf32, #tpu.memory_space<vmem>>, vector<32x256xf32>
    tpu.vector_store %arg6[%c96_40, %c0_41], %71 {strides = array<i32>} : memref<288x256xf32, #tpu.memory_space<vmem>>, vector<32x256xf32>,
    %c128_42 = arith.constant 128 : index
    %c0_43 = arith.constant 0 : index
    %73 = vector.load %arg6[%c128_42, %c0_43] : memref<288x256xf32, #tpu.memory_space<vmem>>, vector<32x256xf32>
    tpu.vector_store %arg6[%c128_42, %c0_43], %64 {strides = array<i32>} : memref<288x256xf32, #tpu.memory_space<vmem>>, vector<32x256xf32>,
    %c255_i32_44 = arith.constant 255 : i32
    %74 = tpu.dynamic_rotate %64 by %c255_i32_44 dim 1 : vector<32x256xf32>, i32 -> vector<32x256xf32>
    %c160_45 = arith.constant 160 : index
    %c0_46 = arith.constant 0 : index
    %75 = vector.load %arg6[%c160_45, %c0_46] : memref<288x256xf32, #tpu.memory_space<vmem>>, vector<32x256xf32>
    tpu.vector_store %arg6[%c160_45, %c0_46], %74 {strides = array<i32>} : memref<288x256xf32, #tpu.memory_space<vmem>>, vector<32x256xf32>,
    %c247_i32_47 = arith.constant 247 : i32
    %76 = tpu.dynamic_rotate %64 by %c247_i32_47 dim 1 : vector<32x256xf32>, i32 -> vector<32x256xf32>
    %c192_48 = arith.constant 192 : index
    %c0_49 = arith.constant 0 : index
    %77 = vector.load %arg6[%c192_48, %c0_49] : memref<288x256xf32, #tpu.memory_space<vmem>>, vector<32x256xf32>
    tpu.vector_store %arg6[%c192_48, %c0_49], %76 {strides = array<i32>} : memref<288x256xf32, #tpu.memory_space<vmem>>, vector<32x256xf32>,
    %c246_i32_50 = arith.constant 246 : i32
    %78 = tpu.dynamic_rotate %64 by %c246_i32_50 dim 1 : vector<32x256xf32>, i32 -> vector<32x256xf32>
    %c224_51 = arith.constant 224 : index
    %c0_52 = arith.constant 0 : index
    %79 = vector.load %arg6[%c224_51, %c0_52] : memref<288x256xf32, #tpu.memory_space<vmem>>, vector<32x256xf32>
    tpu.vector_store %arg6[%c224_51, %c0_52], %78 {strides = array<i32>} : memref<288x256xf32, #tpu.memory_space<vmem>>, vector<32x256xf32>,
    %c245_i32_53 = arith.constant 245 : i32
    %80 = tpu.dynamic_rotate %64 by %c245_i32_53 dim 1 : vector<32x256xf32>, i32 -> vector<32x256xf32>
    %c256_54 = arith.constant 256 : index
    %c0_55 = arith.constant 0 : index
    %81 = vector.load %arg6[%c256_54, %c0_55] : memref<288x256xf32, #tpu.memory_space<vmem>>, vector<32x256xf32>
    tpu.vector_store %arg6[%c256_54, %c0_55], %80 {strides = array<i32>} : memref<288x256xf32, #tpu.memory_space<vmem>>, vector<32x256xf32>,
    %c1 = arith.constant 1 : index
    %c0_56 = arith.constant 0 : index
    %c0_57 = arith.constant 0 : index
    %82 = vector.load %arg2[%c1, %c0_56, %c0_57] : memref<2x32x288xf32, #tpu.memory_space<vmem>>, vector<1x32x288xf32>
    %83 = vector.shape_cast %82 : vector<1x32x288xf32> to vector<32x288xf32>
    %c0_58 = arith.constant 0 : index
    %c0_59 = arith.constant 0 : index
    %84 = vector.load %arg6[%c0_58, %c0_59] : memref<288x256xf32, #tpu.memory_space<vmem>>, vector<288x256xf32>
    %cst_60 = arith.constant dense<0.000000e+00> : vector<32x256xf32>
    %85 = tpu.matmul %83, %84, %cst_60 {dimension_numbers = #tpu.dot_dimension_numbers<[1], [0], [0], [1], [0, 0, 1, 1], [], []>} : vector<32x288xf32>, vector<288x256xf32>, vector<32x256xf32> -> vector<32x256xf32>
    %86 = vector.extract_strided_slice %2 {offsets = [0, 2], sizes = [32, 1], strides = [1, 1]} : vector<32x4xf32> to vector<32x1xf32>
    %87 = vector.extract_strided_slice %2 {offsets = [0, 3], sizes = [32, 1], strides = [1, 1]} : vector<32x4xf32> to vector<32x1xf32>
    %88 = vector.broadcast %1 : vector<1x256xf32> to vector<32x256xf32>
    %89 = arith.mulf %85, %88 : vector<32x256xf32>
    %cst_61 = arith.constant dense<0.000000e+00> : vector<32xf32>
    %90 = vector.multi_reduction <add>, %89, %cst_61 [1] : vector<32x256xf32> to vector<32xf32>
    %91 = vector.shape_cast %90 : vector<32xf32> to vector<32x1xf32>
    %cst_62 = arith.constant 7.812500e-03 : f32
    %92 = vector.broadcast %cst_62 : f32 to vector<32x1xf32>
    %93 = arith.mulf %91, %92 : vector<32x1xf32>
    %94 = vector.broadcast %93 : vector<32x1xf32> to vector<32x256xf32>
    %95 = arith.subf %85, %94 : vector<32x256xf32>
    %96 = vector.broadcast %1 : vector<1x256xf32> to vector<32x256xf32>
    %97 = arith.mulf %95, %96 : vector<32x256xf32>
    %98 = arith.mulf %97, %97 : vector<32x256xf32>
    %cst_63 = arith.constant dense<0.000000e+00> : vector<32xf32>
    %99 = vector.multi_reduction <add>, %98, %cst_63 [1] : vector<32x256xf32> to vector<32xf32>
    %100 = vector.shape_cast %99 : vector<32xf32> to vector<32x1xf32>
    %cst_64 = arith.constant 7.812500e-03 : f32
    %101 = vector.broadcast %cst_64 : f32 to vector<32x1xf32>
    %102 = arith.mulf %100, %101 : vector<32x1xf32>
    %cst_65 = arith.constant 9.99999974E-6 : f32
    %103 = vector.broadcast %cst_65 : f32 to vector<32x1xf32>
    %104 = arith.addf %102, %103 : vector<32x1xf32>
    %105 = math.rsqrt %104 : vector<32x1xf32>
    %106 = arith.mulf %86, %105 : vector<32x1xf32>
    %107 = arith.mulf %93, %106 : vector<32x1xf32>
    %108 = arith.subf %87, %107 : vector<32x1xf32>
    %109 = vector.broadcast %106 : vector<32x1xf32> to vector<32x256xf32>
    %110 = arith.mulf %85, %109 : vector<32x256xf32>
    %111 = vector.broadcast %108 : vector<32x1xf32> to vector<32x256xf32>
    %112 = arith.addf %110, %111 : vector<32x256xf32>
    %113 = arith.addf %112, %0 : vector<32x256xf32>
    %cst_66 = arith.constant 0.000000e+00 : f32
    %114 = vector.broadcast %cst_66 : f32 to vector<32x256xf32>
    %115 = arith.cmpf ogt, %113, %114 : vector<32x256xf32>
    %cst_67 = arith.constant 0.000000e+00 : f32
    %116 = vector.broadcast %cst_67 : f32 to vector<32x256xf32>
    %117 = arith.minimumf %113, %116 : vector<32x256xf32>
    %118 = math.exp %117 : vector<32x256xf32>
    %cst_68 = arith.constant 1.000000e+00 : f32
    %119 = vector.broadcast %cst_68 : f32 to vector<32x256xf32>
    %120 = arith.subf %118, %119 : vector<32x256xf32>
    %cst_69 = arith.constant 1.67326319 : f32
    %121 = vector.broadcast %cst_69 : f32 to vector<32x256xf32>
    %122 = arith.mulf %121, %120 : vector<32x256xf32>
    %123 = arith.select %115, %113, %122 : vector<32x256xi1>, vector<32x256xf32>
    %cst_70 = arith.constant 1.05070102 : f32
    %124 = vector.broadcast %cst_70 : f32 to vector<32x256xf32>
    %125 = arith.mulf %124, %123 : vector<32x256xf32>
    %c0_71 = arith.constant 0 : index
    %c0_72 = arith.constant 0 : index
    %126 = vector.load %arg5[%c0_71, %c0_72] : memref<32x256xf32, #tpu.memory_space<vmem>>, vector<32x256xf32>
    tpu.vector_store %arg5[%c0_71, %c0_72], %125 {strides = array<i32>} : memref<32x256xf32, #tpu.memory_space<vmem>>, vector<32x256xf32>,
    return
  }
  func.func @transform_0(%arg0: i32) -> (i32, i32) {
    %c0_i32 = arith.constant 0 : i32
    %c0_i32_0 = arith.constant 0 : i32
    %c0_i32_1 = arith.constant 0 : i32
    return %c0_i32, %c0_i32_0 : i32, i32
  }
  func.func @transform_1(%arg0: i32) -> (i32, i32, i32) {
    %c0_i32 = arith.constant 0 : i32
    %c0_i32_0 = arith.constant 0 : i32
    %c0_i32_1 = arith.constant 0 : i32
    %c0_i32_2 = arith.constant 0 : i32
    return %c0_i32, %c0_i32_0, %c0_i32_1 : i32, i32, i32
  }
  func.func @transform_2(%arg0: i32) -> (i32, i32) {
    %c0_i32 = arith.constant 0 : i32
    %c0_i32_0 = arith.constant 0 : i32
    %c0_i32_1 = arith.constant 0 : i32
    return %c0_i32, %c0_i32_0 : i32, i32
  }
  func.func @transform_3(%arg0: i32) -> (i32, i32) {
    %c0_i32 = arith.constant 0 : i32
    %c0_i32_0 = arith.constant 0 : i32
    %c0_i32_1 = arith.constant 0 : i32
    return %c0_i32, %c0_i32_0 : i32, i32
  }
  func.func @transform_4(%arg0: i32) -> (i32, i32) {
    %c0_i32 = arith.constant 0 : i32
    %c0_i32_0 = arith.constant 0 : i32
    %c0_i32_1 = arith.constant 0 : i32
    return %c0_i32, %c0_i32_0 : i32, i32
  }
}

</mosaic_0001>

<bundles_post_ra>
// kernel: residual_block_forward.1
= control target key start
LH: loop header
LB: loop body
LE: loop exit
PB: predicated region body
PF: predicated region fallthrough
CT: control target
= control target key end

     0   :  { %s2101_s23 = smov 1   ;;  %s2102_s24 = smov 9   ;;  %v46_v14 = vlaneseq  ;;  %vm388_vm6 = vcmask 261120   ;;  %s3189_s0 = inlined_call_operand.vmem [shape: f32[32,256], index: 0, kind: input, shape index: {}]   ;;  %s3190_s1 = inlined_call_operand.vmem [shape: f32[2,32,288], index: 1, kind: input, shape index: {}]   ;;  %s3191_s3 = inlined_call_operand.vmem [shape: f32[1,256], index: 3, kind: input, shape index: {}]   ;;  %s3192_s2 = inlined_call_operand.vmem [shape: f32[32,4], index: 2, kind: input, shape index: {}]   ;;  %s3193_s4 = inlined_call_operand.vmem [shape: f32[32,256], index: 4, kind: output, shape index: {}]  }
   0x1   :  { %v2141_v0 = vld [vmem:[%s3189_s0 + $0x30] sm:$0xff]  ;;  %v2146_v1 = vld [vmem:[%s3189_s0 + $0x38] sm:$0xff]  ;;  %v2168_v6 = vld [vmem:[%s3189_s0 + $0x20] sm:$0xff]  ;;  %s2103_s7 = smov 10   ;;  %s2104_s8 = smov 117  }
   0x2   :  { %v2151_v2 = vld [vmem:[%s3189_s0 + $0x10] sm:$0xff]  ;;  %v1711_v3 = vpack.i.bf16 %v2146_v1, %v2141_v0  ;;  %v2158_v4 = vld [vmem:[%s3189_s0 + $0x18] sm:$0xff]  ;;  %v2173_v7 = vld [vmem:[%s3189_s0 + $0x28] sm:$0xff]  ;;  %s2105_s9 = smov 118   ;;  %s2106_s10 = smov 11   ;;  %v2220_v16 = vand.u32 127, %v46_v14 }
   0x3   :  { %v1721_v5 = vpack.i.bf16 %v2158_v4, %v2151_v2  ;;  %v2178_v8 = vld [vmem:[%s3189_s0] sm:$0xff]  ;;  %v2183_v9 = vld [vmem:[%s3189_s0 + $0x8] sm:$0xff]  ;;  %v1716_v10 = vpack.i.bf16 %v2173_v7, %v2168_v6  ;;  %s2107_s11 = smov 119   ;;  %s2108_s12 = smov 127  }
   0x4   :  { %1712 = vrot.lane.b32.xlu0 %v1711_v3, %s2101_s23  ;;  %1732 = vrot.lane.b32.xlu2 %v1711_v3, %s2102_s24  ;;  %v1726_v11 = vpack.i.bf16 %v2183_v9, %v2178_v8  ;;  %vm147_vm0 = vcmp.lt.s32.totalorder %v2220_v16, 1  ;;  %vm114_vm1 = vcmp.lt.s32.totalorder %v2220_v16, 9  ;;  %vm254_vm2 = vcmp.lt.s32.totalorder %v2220_v16, 118 }
   0x5   :  { %1722 = vrot.lane.b32.xlu1 %v1721_v5, %s2101_s23  ;;  %vm81_vm3 = vcmp.lt.s32.totalorder %v2220_v16, 10  ;;  %vm287_vm4 = vcmp.lt.s32.totalorder %v2220_v16, 117  ;;  %vm48_vm5 = vcmp.lt.s32.totalorder %v2220_v16, 11  ;;  %vm221_vm7 = vcmp.lt.s32.totalorder %v2220_v16, 119 }
   0x6   :  { %vm188_vm8 = vcmp.lt.s32.totalorder %v2220_v16, 127  ;;  %v1682_v16 = vld [vmem:[%s3190_s1 + $0xb8] sm:$0xff] }
   0xc   :  { %1717 = vrot.lane.b32.xlu0 %v1716_v10, %s2101_s23  ;;  %1737 = vrot.lane.b32.xlu2 %v1716_v10, %s2102_s24 }
   0xd   :  { %1727 = vrot.lane.b32.xlu1 %v1726_v11, %s2101_s23 }
  0x14   :  { %1742 = vrot.lane.b32.xlu0 %v1721_v5, %s2102_s24  ;;  %1752 = vrot.lane.b32.xlu2 %v1711_v3, %s2103_s7 }
  0x15   :  { %1747 = vrot.lane.b32.xlu1 %v1726_v11, %s2102_s24 }
  0x1c   :  { %1757 = vrot.lane.b32.xlu0 %v1711_v3, %s2104_s8  ;;  %1767 = vrot.lane.b32.xlu2 %v1716_v10, %s2104_s8 }
  0x1d   :  { %1762 = vrot.lane.b32.xlu1 %v1716_v10, %s2103_s7 }
  0x24   :  { %1772 = vrot.lane.b32.xlu0 %v1721_v5, %s2103_s7  ;;  %1782 = vrot.lane.b32.xlu2 %v1726_v11, %s2103_s7 }
  0x25   :  { %1777 = vrot.lane.b32.xlu1 %v1721_v5, %s2104_s8 }
  0x2c   :  { %1787 = vrot.lane.b32.xlu0 %v1726_v11, %s2104_s8  ;;  %1797 = vrot.lane.b32.xlu2 %v1711_v3, %s2105_s9 }
  0x2d   :  { %1792 = vrot.lane.b32.xlu1 %v1711_v3, %s2106_s10 }
  0x34   :  { %1802 = vrot.lane.b32.xlu0 %v1716_v10, %s2106_s10  ;;  %1812 = vrot.lane.b32.xlu2 %v1721_v5, %s2106_s10 }
  0x35   :  { %1807 = vrot.lane.b32.xlu1 %v1716_v10, %s2105_s9 }
  0x3c   :  { %1817 = vrot.lane.b32.xlu0 %v1721_v5, %s2105_s9  ;;  %1827 = vrot.lane.b32.xlu2 %v1726_v11, %s2105_s9 }
  0x3d   :  { %1822 = vrot.lane.b32.xlu1 %v1726_v11, %s2106_s10 }
  0x44   :  { %1832 = vrot.lane.b32.xlu0 %v1711_v3, %s2107_s11  ;;  %1842 = vrot.lane.b32.xlu2 %v1721_v5, %s2107_s11 }
  0x45   :  { %1837 = vrot.lane.b32.xlu1 %v1716_v10, %s2107_s11 }
  0x4c   :  { %1847 = vrot.lane.b32.xlu0 %v1726_v11, %s2107_s11  ;;  %1857 = vrot.lane.b32.xlu2 %v1716_v10, %s2108_s12 }
  0x4d   :  { %1852 = vrot.lane.b32.xlu1 %v1711_v3, %s2108_s12 }
  0x54   :  { %1862 = vrot.lane.b32.xlu0 %v1721_v5, %s2108_s12 }
  0x55   :  { %1867 = vrot.lane.b32.xlu1 %v1726_v11, %s2108_s12 }
  0x5e   :  { %v1733_v12 = vpop.permute.xlu2 %1732 }
  0x5f   :  { %v1735_v35 = vunpack.i.h.bf16 %v1733_v12  ;;  %v1734_v36 = vunpack.i.l.bf16 %v1733_v12 }
  0x61   :  { %v122_v44 = vsel %vm114_vm1, %v1735_v35, %v1734_v36  ;;  %v118_v45 = vsel %vm114_vm1, %v1734_v36, %v1735_v35 }
  0x66   :  { %v1738_v13 = vpop.permute.xlu2 %1737 }
  0x67   :  { %v1740_v37 = vunpack.i.h.bf16 %v1738_v13  ;;  %v1739_v38 = vunpack.i.l.bf16 %v1738_v13 }
  0x69   :  { %v121_v46 = vsel %vm114_vm1, %v1740_v37, %v1739_v38  ;;  %v117_v53 = vsel %vm114_vm1, %v1739_v38, %v1740_v37 }
  0x6e   :  { %v2218_v15 = vpop.permute.xlu2 %1752 }
  0x6f   :  { %v1755_v54 = vunpack.i.h.bf16 %v2218_v15  ;;  %v1754_v55 = vunpack.i.l.bf16 %v2218_v15 }
  0x71   :  { %v89_v61 = vsel %vm81_vm3, %v1755_v54, %v1754_v55  ;;  %v85_v62 = vsel %vm81_vm3, %v1754_v55, %v1755_v54 }
  0x76   :  { %v1713_v17 = vpop.permute.xlu0 %1712  ;;  %v2223_v18 = vpop.permute.xlu2 %1767 }
  0x77   :  { %v1715_v19 = vunpack.i.h.bf16 %v1713_v17  ;;  %v1714_v20 = vunpack.i.l.bf16 %v1713_v17  ;;  %v1723_v21 = vpop.permute.xlu1 %1722  ;;  %v1770_v5 = vunpack.i.h.bf16 %v2223_v18  ;;  %v1769_v10 = vunpack.i.l.bf16 %v2223_v18 }
  0x78   :  { %v1725_v26 = vunpack.i.h.bf16 %v1723_v21  ;;  %v1724_v27 = vunpack.i.l.bf16 %v1723_v21 }
  0x79   :  { %v155_v22 = vsel %vm147_vm0, %v1715_v19, %v1714_v20  ;;  %v151_v23 = vsel %vm147_vm0, %v1714_v20, %v1715_v19  ;;  %v290_v20 = vsel %vm287_vm4, %v1769_v10, %v1770_v5 }
  0x7a   :  { %401 = vmatpush.msra.mxu0 %v155_v22  ;;  %488 = vmatpush.msra.mxu3 %v151_v23  ;;  %v153_v39 = vsel %vm147_vm0, %v1725_v26, %v1724_v27  ;;  %v149_v40 = vsel %vm147_vm0, %v1724_v27, %v1725_v26 }
  0x7e   :  { %v1718_v24 = vpop.permute.xlu0 %1717  ;;  %v2229_v25 = vpop.permute.xlu2 %1782 }
  0x7f   :  { %v1720_v28 = vunpack.i.h.bf16 %v1718_v24  ;;  %v1719_v29 = vunpack.i.l.bf16 %v1718_v24  ;;  %v1728_v30 = vpop.permute.xlu1 %1727  ;;  %v1785_v23 = vunpack.i.h.bf16 %v2229_v25  ;;  %v1784_v24 = vunpack.i.l.bf16 %v2229_v25 }
  0x80   :  { %v1730_v31 = vunpack.i.h.bf16 %v1728_v30  ;;  %v1729_v32 = vunpack.i.l.bf16 %v1728_v30 }
  0x81   :  { %v154_v33 = vsel %vm147_vm0, %v1720_v28, %v1719_v29  ;;  %v150_v34 = vsel %vm147_vm0, %v1719_v29, %v1720_v28  ;;  %v82_v25 = vsel %vm81_vm3, %v1784_v24, %v1785_v23 }
  0x82   :  { %402 = vmatpush.msra.mxu0 %v154_v33  ;;  %489 = vmatpush.msra.mxu3 %v150_v34  ;;  %v152_v41 = vsel %vm147_vm0, %v1730_v31, %v1729_v32  ;;  %v148_v42 = vsel %vm147_vm0, %v1729_v32, %v1730_v31  ;;  %v86_v34 = vsel %vm81_vm3, %v1785_v23, %v1784_v24 }
  0x84   :  { %403 = vmatpush.msra.mxu0 %v153_v39  ;;  %490 = vmatpush.msra.mxu3 %v149_v40 }
  0x86   :  { %v1743_v43 = vpop.permute.xlu0 %1742  ;;  %404 = vmatpush.msra.mxu0 %v152_v41  ;;  %491 = vmatpush.msra.mxu3 %v148_v42  ;;  %v2250_v47 = vpop.permute.xlu2 %1797 }
  0x87   :  { %v1745_v48 = vunpack.i.h.bf16 %v1743_v43  ;;  %v1744_v49 = vunpack.i.l.bf16 %v1743_v43  ;;  %v1748_v50 = vpop.permute.xlu1 %1747  ;;  %v1800_v51 = vunpack.i.h.bf16 %v2250_v47  ;;  %v1799_v52 = vunpack.i.l.bf16 %v2250_v47 }
  0x88   :  { %405 = vmatpush.msra.mxu0 %v122_v44  ;;  %492 = vmatpush.msra.mxu3 %v118_v45  ;;  %v1750_v56 = vunpack.i.h.bf16 %v1748_v50  ;;  %v1749_v57 = vunpack.i.l.bf16 %v1748_v50 }
  0x89   :  { %v258_v58 = vsel %vm254_vm2, %v1799_v52, %v1800_v51  ;;  %v120_v59 = vsel %vm114_vm1, %v1745_v48, %v1744_v49  ;;  %v116_v60 = vsel %vm114_vm1, %v1744_v49, %v1745_v48  ;;  %v262_v44 = vsel %vm254_vm2, %v1800_v51, %v1799_v52  ;;  %v2345_v48 = vld [vmem:[%s3190_s1 + $0x10] sm:$0xff] }
  0x8a   :  { %406 = vmatpush.msra.mxu0 %v121_v46  ;;  %493 = vmatpush.msra.mxu3 %v117_v53  ;;  %v119_v63 = vsel %vm114_vm1, %v1750_v56, %v1749_v57  ;;  %v115_v3 = vsel %vm114_vm1, %v1749_v57, %v1750_v56 }
  0x8b   :  { %430 = vmatpush.msra.mxu1 %v258_v58 }
  0x8c   :  { %407 = vmatpush.msra.mxu0 %v120_v59  ;;  %494 = vmatpush.msra.mxu3 %v116_v60 }
  0x8e   :  { %v2280_v11 = vpop.permute.xlu0 %1757  ;;  %408 = vmatpush.msra.mxu0 %v119_v63  ;;  %495 = vmatpush.msra.mxu3 %v115_v3  ;;  %v1813_v37 = vpop.permute.xlu2 %1812  ;;  %v2364_v63 = vld [vmem:[%s3190_s1 + $0x28] sm:$0xff] }
  0x8f   :  { %v1760_v12 = vunpack.i.h.bf16 %v2280_v11  ;;  %v1759_v13 = vunpack.i.l.bf16 %v2280_v11  ;;  %v1763_v14 = vpop.permute.xlu1 %1762  ;;  %v1815_v47 = vunpack.i.h.bf16 %v1813_v37  ;;  %v1814_v49 = vunpack.i.l.bf16 %v1813_v37 }
  0x90   :  { %v1765_v15 = vunpack.i.h.bf16 %v1763_v14  ;;  %v1764_v17 = vunpack.i.l.bf16 %v1763_v14  ;;  %409 = vmatpush.msra.mxu0 %v89_v61  ;;  %496 = vmatpush.msra.mxu3 %v85_v62  ;;  %v294_v37 = vsel %vm287_vm4, %v1770_v5, %v1769_v10 }
  0x91   :  { %v291_v19 = vsel %vm287_vm4, %v1759_v13, %v1760_v12  ;;  %v54_v59 = vsel %vm48_vm5, %v1815_v47, %v1814_v49  ;;  %v50_v60 = vsel %vm48_vm5, %v1814_v49, %v1815_v47 }
  0x92   :  { %471 = vmatpush.msra.mxu2 %v291_v19  ;;  %v88_v21 = vsel %vm81_vm3, %v1765_v15, %v1764_v17  ;;  %v84_v22 = vsel %vm81_vm3, %v1764_v17, %v1765_v15 }
  0x93   :  { %410 = vmatpush.msra.mxu0 %v88_v21  ;;  %497 = vmatpush.msra.mxu3 %v84_v22 }
  0x94   :  { %472 = vmatpush.msra.mxu2 %v290_v20 }
  0x96   :  { %v1773_v26 = vpop.permute.xlu0 %1772  ;;  %v1828_v56 = vpop.permute.xlu2 %1827 }
  0x97   :  { %v1775_v27 = vunpack.i.h.bf16 %v1773_v26  ;;  %v1774_v28 = vunpack.i.l.bf16 %v1773_v26  ;;  %v2303_v29 = vpop.permute.xlu1 %1777  ;;  %v1830_v3 = vunpack.i.h.bf16 %v1828_v56  ;;  %v1829_v14 = vunpack.i.l.bf16 %v1828_v56 }
  0x98   :  { %v1780_v30 = vunpack.i.h.bf16 %v2303_v29  ;;  %v1779_v31 = vunpack.i.l.bf16 %v2303_v29 }
  0x99   :  { %v87_v32 = vsel %vm81_vm3, %v1775_v27, %v1774_v28  ;;  %v83_v33 = vsel %vm81_vm3, %v1774_v28, %v1775_v27  ;;  %v255_v26 = vsel %vm254_vm2, %v1829_v14, %v1830_v3 }
  0x9a   :  { %411 = vmatpush.msra.mxu0 %v87_v32  ;;  %498 = vmatpush.msra.mxu3 %v83_v33  ;;  %v289_v35 = vsel %vm287_vm4, %v1779_v31, %v1780_v30  ;;  %v259_v32 = vsel %vm254_vm2, %v1830_v3, %v1829_v14 }
  0x9b   :  { %473 = vmatpush.msra.mxu2 %v289_v35  ;;  %v2392_v35 = vld [vmem:[%s3190_s1 + $0x40] sm:$0xff] }
  0x9c   :  { %412 = vmatpush.msra.mxu0 %v86_v34  ;;  %499 = vmatpush.msra.mxu3 %v82_v25  ;;  %v304_v34 = vld [vmem:[%s3190_s1] sm:$0xff]  ;;  %v295_v25 = vsel %vm287_vm4, %v1760_v12, %v1759_v13  ;;  %v293_v12 = vsel %vm287_vm4, %v1780_v30, %v1779_v31 }
  0x9e   :  { %v2321_v36 = vpop.permute.xlu0 %1787  ;;  %v1843_v33 = vpop.permute.xlu2 %1842 }
  0x9f   :  { %v1790_v38 = vunpack.i.h.bf16 %v2321_v36  ;;  %v1789_v39 = vunpack.i.l.bf16 %v2321_v36  ;;  %v1793_v40 = vpop.permute.xlu1 %1792  ;;  %v1845_v5 = vunpack.i.h.bf16 %v1843_v33  ;;  %v1844_v10 = vunpack.i.l.bf16 %v1843_v33  ;;  %v307_v36 = vld [vmem:[%s3190_s1 + $0x18] sm:$0xff] }
  0xa0   :  { %v1795_v41 = vunpack.i.h.bf16 %v1793_v40  ;;  %v1794_v42 = vunpack.i.l.bf16 %v1793_v40 }
  0xa1   :  { %v288_v43 = vsel %vm287_vm4, %v1789_v39, %v1790_v38  ;;  %v292_v29 = vsel %vm287_vm4, %v1790_v38, %v1789_v39  ;;  %v223_v38 = vsel %vm221_vm7, %v1844_v10, %v1845_v5  ;;  %v2431_v39 = vld [vmem:[%s3190_s1 + $0x58] sm:$0xff] }
  0xa2   :  { %474 = vmatpush.msra.mxu2 %v288_v43  ;;  %v56_v45 = vsel %vm48_vm5, %v1795_v41, %v1794_v42  ;;  %v52_v46 = vsel %vm48_vm5, %v1794_v42, %v1795_v41 }
  0xa3   :  { %413 = vmatpush.msra.mxu0 %v56_v45  ;;  %500 = vmatpush.msra.mxu3 %v52_v46  ;;  %v227_v45 = vsel %vm221_vm7, %v1845_v5, %v1844_v10 }
  0xa4   :  { %517 = vmatpush.msrb.mxu2 %v262_v44 }
  0xa5   :  { %1655 = vmatmul.msk.f32.vlgmr.msra.gmra.mxu2 %vm388_vm6, %v2345_v48 }
  0xa6   :  { %v1803_v50 = vpop.permute.xlu0 %1802  ;;  %v1858_v46 = vpop.permute.xlu2 %1857 }
  0xa7   :  { %v1805_v51 = vunpack.i.h.bf16 %v1803_v50  ;;  %v1804_v52 = vunpack.i.l.bf16 %v1803_v50  ;;  %v1808_v53 = vpop.permute.xlu1 %1807 }
  0xa8   :  { %v1810_v54 = vunpack.i.h.bf16 %v1808_v53  ;;  %v1809_v55 = vunpack.i.l.bf16 %v1808_v53  ;;  %v1859_v53 = vunpack.i.l.bf16 %v1858_v46 }
  0xa9   :  { %v55_v57 = vsel %vm48_vm5, %v1805_v51, %v1804_v52  ;;  %v51_v58 = vsel %vm48_vm5, %v1804_v52, %v1805_v51  ;;  %v1860_v52 = vunpack.i.h.bf16 %v1858_v46 }
  0xaa   :  { %414 = vmatpush.msra.mxu0 %v55_v57  ;;  %501 = vmatpush.msra.mxu3 %v51_v58  ;;  %v257_v61 = vsel %vm254_vm2, %v1809_v55, %v1810_v54  ;;  %v261_v62 = vsel %vm254_vm2, %v1810_v54, %v1809_v55 }
  0xab   :  { %431 = vmatpush.msra.mxu1 %v257_v61  ;;  %518 = vmatpush.msrb.mxu2 %v261_v62  ;;  %v191_v61 = vsel %vm188_vm8, %v1859_v53, %v1860_v52  ;;  %v195_v62 = vsel %vm188_vm8, %v1860_v52, %v1859_v53 }
  0xac   :  { %415 = vmatpush.msra.mxu0 %v54_v59  ;;  %502 = vmatpush.msra.mxu3 %v50_v60  ;;  %v310_v60 = vld [vmem:[%s3190_s1 + $0x30] sm:$0xff] }
  0xad   :  { %1656 = vmatmul.msk.f32.gmra.mxu2 %vm388_vm6, %v2364_v63 }
  0xae   :  { %v1818_v15 = vpop.permute.xlu0 %1817 }
  0xaf   :  { %v1820_v17 = vunpack.i.h.bf16 %v1818_v15  ;;  %v1819_v19 = vunpack.i.l.bf16 %v1818_v15  ;;  %v1823_v20 = vpop.permute.xlu1 %1822 }
  0xb0   :  { %v1825_v21 = vunpack.i.h.bf16 %v1823_v20  ;;  %v1824_v22 = vunpack.i.l.bf16 %v1823_v20 }
  0xb1   :  { %v256_v23 = vsel %vm254_vm2, %v1819_v19, %v1820_v17  ;;  %v260_v24 = vsel %vm254_vm2, %v1820_v17, %v1819_v19 }
  0xb2   :  { %v53_v27 = vsel %vm48_vm5, %v1825_v21, %v1824_v22  ;;  %432 = vmatpush.msra.mxu1 %v256_v23  ;;  %519 = vmatpush.msrb.mxu2 %v260_v24  ;;  %v49_v28 = vsel %vm48_vm5, %v1824_v22, %v1825_v21 }
  0xb3   :  { %416 = vmatpush.msra.mxu0 %v53_v27  ;;  %503 = vmatpush.msra.mxu3 %v49_v28  ;;  %v305_v27 = vld [vmem:[%s3190_s1 + $0x8] sm:$0xff] }
  0xb4   :  { %433 = vmatpush.msra.mxu1 %v255_v26  ;;  %520 = vmatpush.msrb.mxu2 %v259_v32  ;;  %v313_v26 = vld [vmem:[%s3190_s1 + $0x48] sm:$0xff] }
  0xb5   :  { %558 = vmatpush.msrb.mxu0 %v295_v25  ;;  %1657 = vmatmul.msk.f32.gmra.mxu2 %vm388_vm6, %v2392_v35 }
  0xb6   :  { %417 = vmatmul.f32.vlgmr.msra.gmra.mxu0 %v304_v34  ;;  %v1833_v11 = vpop.permute.xlu0 %1832  ;;  %504 = vmatmul.f32.vlgmr.msra.gmra.mxu3 %v304_v34 }
  0xb7   :  { %559 = vmatpush.msrb.mxu0 %v294_v37  ;;  %v1835_v18 = vunpack.i.h.bf16 %v1833_v11  ;;  %v1834_v13 = vunpack.i.l.bf16 %v1833_v11  ;;  %v1838_v40 = vpop.permute.xlu1 %1837 }
  0xb8   :  { %v1840_v41 = vunpack.i.h.bf16 %v1838_v40  ;;  %v1839_v42 = vunpack.i.l.bf16 %v1838_v40 }
  0xb9   :  { %560 = vmatpush.msrb.mxu0 %v293_v12  ;;  %v225_v30 = vsel %vm221_vm7, %v1834_v13, %v1835_v18  ;;  %v229_v31 = vsel %vm221_vm7, %v1835_v18, %v1834_v13  ;;  %v25_v13 = vld [vmem:[%s3191_s3] sm:$0x3] }
  0xba   :  { %434 = vmatpush.msra.mxu1 %v225_v30  ;;  %v224_v43 = vsel %vm221_vm7, %v1839_v42, %v1840_v41  ;;  %v228_v44 = vsel %vm221_vm7, %v1840_v41, %v1839_v42  ;;  %521 = vmatpush.msrb.mxu2 %v229_v31  ;;  %v2499_v42 = vperm.slane %v25_v13, 0 }
  0xbb   :  { %561 = vmatpush.msrb.mxu0 %v292_v29  ;;  %v2501_v29 = vperm.slane %v25_v13, 1 }
  0xbc   :  { %435 = vmatpush.msra.mxu1 %v224_v43  ;;  %522 = vmatpush.msrb.mxu2 %v228_v44 }
  0xbd   :  { %1658 = vmatmul.msk.f32.gmra.mxu2 %vm388_vm6, %v2431_v39 }
  0xbe   :  { %420 = vmatmul.f32.gmra.mxu0 %v307_v36  ;;  %v1848_v47 = vpop.permute.xlu0 %1847  ;;  %436 = vmatpush.msra.mxu1 %v223_v38 }
  0xbf   :  { %v1850_v49 = vunpack.i.h.bf16 %v1848_v47  ;;  %v1849_v50 = vunpack.i.l.bf16 %v1848_v47  ;;  %v1853_v51 = vpop.permute.xlu1 %1852  ;;  %523 = vmatpush.msrb.mxu2 %v227_v45  ;;  %507 = vmatmul.f32.gmra.mxu3 %v307_v36 }
  0xc0   :  { %v1855_v54 = vunpack.i.h.bf16 %v1853_v51  ;;  %v1854_v55 = vunpack.i.l.bf16 %v1853_v51 }
  0xc1   :  { %v222_v56 = vsel %vm221_vm7, %v1849_v50, %v1850_v49  ;;  %v226_v57 = vsel %vm221_vm7, %v1850_v49, %v1849_v50 }
  0xc2   :  { %437 = vmatpush.msra.mxu1 %v222_v56  ;;  %524 = vmatpush.msrb.mxu2 %v226_v57  ;;  %v192_v58 = vsel %vm188_vm8, %v1854_v55, %v1855_v54  ;;  %v196_v59 = vsel %vm188_vm8, %v1855_v54, %v1854_v55 }
  0xc4   :  { %438 = vmatpush.msra.mxu1 %v192_v58  ;;  %525 = vmatpush.msrb.mxu2 %v196_v59 }
  0xc6   :  { %423 = vmatmul.f32.gmra.mxu0 %v310_v60  ;;  %v1863_v3 = vpop.permute.xlu0 %1862  ;;  %439 = vmatpush.msra.mxu1 %v191_v61 }
  0xc7   :  { %526 = vmatpush.msrb.mxu2 %v195_v62  ;;  %v1865_v14 = vunpack.i.h.bf16 %v1863_v3  ;;  %v1864_v15 = vunpack.i.l.bf16 %v1863_v3  ;;  %v1868_v17 = vpop.permute.xlu1 %1867  ;;  %510 = vmatmul.f32.gmra.mxu3 %v310_v60 }
  0xc8   :  { %v1870_v19 = vunpack.i.h.bf16 %v1868_v17  ;;  %v1869_v20 = vunpack.i.l.bf16 %v1868_v17 }
  0xc9   :  { %v190_v21 = vsel %vm188_vm8, %v1864_v15, %v1865_v14  ;;  %v194_v22 = vsel %vm188_vm8, %v1865_v14, %v1864_v15 }
  0xca   :  { %440 = vmatpush.msra.mxu1 %v190_v21  ;;  %527 = vmatpush.msrb.mxu2 %v194_v22  ;;  %v189_v23 = vsel %vm188_vm8, %v1869_v20, %v1870_v19  ;;  %v193_v24 = vsel %vm188_vm8, %v1870_v19, %v1869_v20 }
  0xcc   :  { %441 = vmatpush.msra.mxu1 %v189_v23  ;;  %528 = vmatpush.msrb.mxu2 %v193_v24 }
  0xce   :  { %426 = vmatmul.f32.gmra.mxu0 %v313_v26  ;;  %442 = vmatpush.msra.mxu1 %v2141_v0  ;;  %v308_v0 = vld [vmem:[%s3190_s1 + $0x20] sm:$0xff] }
  0xcf   :  { %529 = vmatpush.msrb.mxu2 %v2146_v1  ;;  %513 = vmatmul.f32.gmra.mxu3 %v313_v26  ;;  %v311_v1 = vld [vmem:[%s3190_s1 + $0x38] sm:$0xff] }
  0xd0   :  { %443 = vmatpush.msra.mxu1 %v2168_v6 }
  0xd1   :  { %530 = vmatpush.msrb.mxu2 %v2173_v7 }
  0xd2   :  { %444 = vmatpush.msra.mxu1 %v2151_v2  ;;  %v314_v2 = vld [vmem:[%s3190_s1 + $0x50] sm:$0xff] }
  0xd3   :  { %531 = vmatpush.msrb.mxu2 %v2158_v4 }
  0xd4   :  { %445 = vmatpush.msra.mxu1 %v2178_v8 }
  0xd5   :  { %532 = vmatpush.msrb.mxu2 %v2183_v9  ;;  %446 = vmatmul.f32.vlgmr.msra.gmra.mxu1 %v305_v27 }
  0xd6   :  { %533 = vmatmul.f32.vlgmr.msrb.gmra.mxu2 %v305_v27  ;;  %1659 = vmatmul.msk.f32.vlgmr.msrb.gmra.mxu0 %vm388_vm6, %v2345_v48 }
  0xdd   :  { %449 = vmatmul.f32.gmra.mxu1 %v308_v0 }
  0xde   :  { %536 = vmatmul.f32.gmra.mxu2 %v308_v0  ;;  %1660 = vmatmul.msk.f32.gmra.mxu0 %vm388_vm6, %v2364_v63 }
  0xe5   :  { %452 = vmatmul.f32.gmra.mxu1 %v311_v1 }
  0xe6   :  { %539 = vmatmul.f32.gmra.mxu2 %v311_v1  ;;  %1661 = vmatmul.msk.f32.gmra.mxu0 %vm388_vm6, %v2392_v35 }
  0xed   :  { %455 = vmatmul.f32.gmra.mxu1 %v314_v2 }
  0xee   :  { %542 = vmatmul.f32.gmra.mxu2 %v314_v2  ;;  %1662 = vmatmul.msk.f32.gmra.mxu0 %vm388_vm6, %v2431_v39 }
 0x128   :  { %v476_v4 = vpop.f32.mrf.mxu2 }
 0x130   :  { %v479_v7 = vpop.f32.mrf.mxu2 }
 0x133   :  { %v418_v6 = vpop.f32.mrf.mxu0 }
 0x138   :  { %v482_v48 = vpop.f32.mrf.mxu2 }
 0x139   :  { %v505_v32 = vpop.f32.mrf.mxu3 }
 0x13b   :  { %v421_v8 = vpop.f32.mrf.mxu0 }
 0x140   :  { %v485_v28 = vpop.f32.mrf.mxu2 }
 0x142   :  { %v508_v37 = vpop.f32.mrf.mxu3 }
 0x143   :  { %v424_v9 = vpop.f32.mrf.mxu0 }
 0x14a   :  { %v511_v30 = vpop.f32.mrf.mxu3 }
 0x14b   :  { %v427_v63 = vpop.f32.mrf.mxu0 }
 0x152   :  { %v447_v33 = vpop.f32.mrf.mxu1  ;;  %v514_v53 = vpop.f32.mrf.mxu3 }
 0x153   :  { %v563_v34 = vpop.f32.mrf.mxu0  ;;  %v448_v61 = vadd.f32 %v447_v33, %v418_v6 }
 0x155   :  { %v2525_v17 = vadd.f32 %v476_v4, %v448_v61 }
 0x157   :  { %v580_v20 = vmul.f32 %v2499_v42, %v2525_v17 }
 0x159   :  { %v534_v25 = vpop.f32.mrf.mxu2 }
 0x15a   :  { %v450_v35 = vpop.f32.mrf.mxu1  ;;  %v535_v59 = vadd.f32 %v534_v25, %v505_v32 }
 0x15b   :  { %v566_v11 = vpop.f32.mrf.mxu0  ;;  %v451_v12 = vadd.f32 %v450_v35, %v421_v8 }
 0x15c   :  { %v2523_v14 = vadd.f32 %v563_v34, %v535_v59 }
 0x15d   :  { %v2495_v40 = vadd.f32 %v479_v7, %v451_v12 }
 0x15e   :  { %v581_v19 = vmul.f32 %v2501_v29, %v2523_v14 }
 0x15f   :  { %v582_v43 = vmul.f32 %v2499_v42, %v2495_v40 }
 0x160   :  { %v588_v21 = vadd.f32 %v581_v19, %v580_v20 }
 0x161   :  { %v537_v18 = vpop.f32.mrf.mxu2 }
 0x162   :  { %v538_v5 = vadd.f32 %v537_v18, %v508_v37  ;;  %v453_v10 = vpop.f32.mrf.mxu1 }
 0x163   :  { %v454_v31 = vadd.f32 %v453_v10, %v424_v9  ;;  %v569_v36 = vpop.f32.mrf.mxu0 }
 0x164   :  { %v2497_v41 = vadd.f32 %v566_v11, %v538_v5 }
 0x165   :  { %v2507_v45 = vadd.f32 %v482_v48, %v454_v31 }
 0x166   :  { %v583_v44 = vmul.f32 %v2501_v29, %v2497_v41 }
 0x167   :  { %v584_v51 = vmul.f32 %v2499_v42, %v2507_v45 }
 0x168   :  { %v591_v38 = vadd.f32 %v583_v44, %v582_v43 }
 0x169   :  { %v540_v39 = vpop.f32.mrf.mxu2 }
 0x16a   :  { %v541_v46 = vadd.f32 %v540_v39, %v511_v30  ;;  %592 = vadd.xlane.f32.xlu1 %v591_v38  ;;  %v456_v47 = vpop.f32.mrf.mxu1 }
 0x16b   :  { %v457_v50 = vadd.f32 %v456_v47, %v427_v63  ;;  %v572_v56 = vpop.f32.mrf.mxu0 }
 0x16c   :  { %v2509_v49 = vadd.f32 %v569_v36, %v541_v46 }
 0x16d   :  { %v2515_v57 = vadd.f32 %v485_v28, %v457_v50 }
 0x16e   :  { %v585_v52 = vmul.f32 %v2501_v29, %v2509_v49 }
 0x16f   :  { %v586_v62 = vmul.f32 %v2499_v42, %v2515_v57 }
 0x170   :  { %v594_v54 = vadd.f32 %v585_v52, %v584_v51 }
 0x171   :  { %v543_v55 = vpop.f32.mrf.mxu2 }
 0x172   :  { %v544_v58 = vadd.f32 %v543_v55, %v514_v53  ;;  %595 = vadd.xlane.f32.xlu0 %v594_v54 }
 0x174   :  { %v2517_v60 = vadd.f32 %v572_v56, %v544_v58  ;;  %v2109_v56 = vmov 0  }
 0x175   :  { %1871 = vset.pattern.permute.xlu1 %v2109_v56  ;;  %1872 = vset.pattern.permute.xlu0 %v2109_v56 }
 0x176   :  { %v587_v3 = vmul.f32 %v2501_v29, %v2517_v60 }
 0x178   :  { %v597_v15 = vadd.f32 %v587_v3, %v586_v62 }
 0x17a   :  { %598 = vadd.xlane.f32.xlu2 %v597_v15 }
 0x182   :  { %589 = vadd.xlane.f32.xlu2 %v588_v21 }
 0x1dd   :  { %v593_v22 = vpop.xlane.xlu1 %592 }
 0x1de   :  { %v2531_v23 = vmul.f32 0.0078125, %v593_v22 }
 0x1e0   :  { %v606_v24 = vsub.f32 %v2495_v40, %v2531_v23  ;;  %v607_v26 = vsub.f32 %v2497_v41, %v2531_v23 }
 0x1e2   :  { %v614_v27 = vmul.f32 %v606_v24, %v2499_v42  ;;  %v615_v0 = vmul.f32 %v607_v26, %v2501_v29  ;;  %v27_v24 = vld [vmem:[%s3192_s2 + $0x8] sm:$0xff] }
 0x1e4   :  { %v622_v1 = vmul.f32 %v614_v27, %v614_v27  ;;  %v623_v2 = vmul.f32 %v615_v0, %v615_v0 }
 0x1e5   :  { %v596_v4 = vpop.xlane.xlu0 %595 }
 0x1e6   :  { %v2539_v6 = vmul.f32 0.0078125, %v596_v4  ;;  %v631_v7 = vadd.f32 %v623_v2, %v622_v1 }
 0x1e8   :  { %v608_v8 = vsub.f32 %v2507_v45, %v2539_v6  ;;  %v609_v9 = vsub.f32 %v2509_v49, %v2539_v6  ;;  %632 = vadd.xlane.f32.xlu1 %v631_v7 }
 0x1ea   :  { %v616_v48 = vmul.f32 %v608_v8, %v2499_v42  ;;  %v617_v63 = vmul.f32 %v609_v9, %v2501_v29 }
 0x1ec   :  { %v624_v28 = vmul.f32 %v616_v48, %v616_v48  ;;  %v625_v32 = vmul.f32 %v617_v63, %v617_v63 }
 0x1ed   :  { %v599_v33 = vpop.xlane.xlu2 %598 }
 0x1ee   :  { %v2547_v34 = vmul.f32 0.0078125, %v599_v33  ;;  %v634_v25 = vadd.f32 %v625_v32, %v624_v28  ;;  %v28_v32 = vld [vmem:[%s3192_s2 + $0x10] sm:$0xff] }
 0x1f0   :  { %v610_v35 = vsub.f32 %v2515_v57, %v2547_v34  ;;  %v611_v37 = vsub.f32 %v2517_v60, %v2547_v34  ;;  %635 = vadd.xlane.f32.xlu0 %v634_v25 }
 0x1f2   :  { %v618_v11 = vmul.f32 %v610_v35, %v2499_v42  ;;  %v619_v12 = vmul.f32 %v611_v37, %v2501_v29 }
 0x1f4   :  { %v626_v18 = vmul.f32 %v618_v11, %v618_v11  ;;  %v627_v13 = vmul.f32 %v619_v12, %v619_v12 }
 0x1f5   :  { %v590_v5 = vpop.xlane.xlu2 %589 }
 0x1f6   :  { %v2555_v10 = vmul.f32 0.0078125, %v590_v5  ;;  %v637_v30 = vadd.f32 %v627_v13, %v626_v18  ;;  %v29_v13 = vld [vmem:[%s3192_s2 + $0x18] sm:$0xff] }
 0x1f8   :  { %v604_v31 = vsub.f32 %v2525_v17, %v2555_v10  ;;  %v605_v43 = vsub.f32 %v2523_v14, %v2555_v10  ;;  %638 = vadd.xlane.f32.xlu2 %v637_v30 }
 0x1fa   :  { %v612_v44 = vmul.f32 %v604_v31, %v2499_v42  ;;  %v613_v36 = vmul.f32 %v605_v43, %v2501_v29 }
 0x1fc   :  { %v620_v38 = vmul.f32 %v612_v44, %v612_v44  ;;  %v621_v39 = vmul.f32 %v613_v36, %v613_v36 }
 0x1fe   :  { %v628_v46 = vadd.f32 %v621_v39, %v620_v38  ;;  %v26_v39 = vld [vmem:[%s3192_s2] sm:$0xff] }
 0x200   :  { %629 = vadd.xlane.f32.xlu2 %v628_v46 }
 0x25b   :  { %v633_v47 = vpop.xlane.xlu1 %632 }
 0x25c   :  { %v641_v50 = vmul.f32 0.0078125, %v633_v47 }
 0x25e   :  { %v645_v51 = vadd.f32 1e-05, %v641_v50 }
 0x260   :  { %2041 = vrsqrt.f32 %v645_v51  ;;  %vm664_vm10 = vweird.f32 %v645_v51 }
 0x263   :  { %v636_v52 = vpop.xlane.xlu0 %635 }
 0x264   :  { %v642_v53 = vmul.f32 0.0078125, %v636_v52 }
 0x266   :  { %v2042_v54 = vpop.eup %2041  ;;  %v646_v55 = vadd.f32 1e-05, %v642_v53 }
 0x267   :  { %v659_v58 = vmul.f32 %v2042_v54, %v645_v51  ;;  %vm665_vm9 = vweird.f32 %v2042_v54 }
 0x268   :  { %2043 = vrsqrt.f32 %v646_v55  ;;  %vm666_vm11 = vmor %vm664_vm10, %vm665_vm9  ;;  %vm674_vm13 = vweird.f32 %v646_v55 }
 0x269   :  { %v660_v59 = vmul.f32 %v2042_v54, %v659_v58 }
 0x26b   :  { %v661_v61 = vmul.f32 0.5, %v660_v59  ;;  %v639_v62 = vpop.xlane.xlu2 %638 }
 0x26c   :  { %v643_v3 = vmul.f32 0.0078125, %v639_v62 }
 0x26d   :  { %v662_v15 = vsub.f32 1.5, %v661_v61 }
 0x26e   :  { %v2044_v19 = vpop.eup %2043  ;;  %v647_v20 = vadd.f32 1e-05, %v643_v3 }
 0x26f   :  { %v663_v21 = vmul.f32 %v2042_v54, %v662_v15  ;;  %v669_v22 = vmul.f32 %v2044_v19, %v646_v55  ;;  %vm675_vm12 = vweird.f32 %v2044_v19 }
 0x270   :  { %2045 = vrsqrt.f32 %v647_v20  ;;  %vm676_vm14 = vmor %vm674_vm13, %vm675_vm12  ;;  %vm684_vm9 = vweird.f32 %v647_v20 }
 0x271   :  { %v670_v26 = vmul.f32 %v2044_v19, %v669_v22  ;;  %v667_v27 = vsel %vm666_vm11, %v2042_v54, %v663_v21 }
 0x272   :  { %v689_v0 = vmul.f32 %v667_v27, %v27_v24 }
 0x273   :  { %v671_v1 = vmul.f32 0.5, %v670_v26  ;;  %v630_v2 = vpop.xlane.xlu2 %629 }
 0x274   :  { %v640_v4 = vmul.f32 0.0078125, %v630_v2  ;;  %v693_v7 = vmul.f32 %v689_v0, %v2531_v23 }
 0x275   :  { %v672_v8 = vsub.f32 1.5, %v671_v1 }
 0x276   :  { %v2046_v9 = vpop.eup %2045  ;;  %v644_v48 = vadd.f32 1e-05, %v640_v4  ;;  %702 = vrot.lane.b32.xlu2 %v693_v7, %s2101_s23 }
 0x277   :  { %v673_v63 = vmul.f32 %v2044_v19, %v672_v8  ;;  %v679_v28 = vmul.f32 %v2046_v9, %v647_v20  ;;  %vm685_vm15 = vweird.f32 %v2046_v9 }
 0x278   :  { %2047 = vrsqrt.f32 %v644_v48  ;;  %vm686_vm10 = vmor %vm684_vm9, %vm685_vm15  ;;  %vm654_vm12 = vweird.f32 %v644_v48 }
 0x279   :  { %v680_v33 = vmul.f32 %v2046_v9, %v679_v28  ;;  %v677_v25 = vsel %vm676_vm14, %v2044_v19, %v673_v63 }
 0x27a   :  { %v690_v35 = vmul.f32 %v677_v25, %v28_v32 }
 0x27b   :  { %v681_v37 = vmul.f32 0.5, %v680_v33 }
 0x27c   :  { %v694_v23 = vmul.f32 %v690_v35, %v2539_v6 }
 0x27d   :  { %v682_v11 = vsub.f32 1.5, %v681_v37 }
 0x27e   :  { %v2048_v12 = vpop.eup %2047  ;;  %704 = vrot.lane.b32.xlu1 %v694_v23, %s2101_s23 }
 0x27f   :  { %v649_v18 = vmul.f32 %v2048_v12, %v644_v48  ;;  %v683_v5 = vmul.f32 %v2046_v9, %v682_v11  ;;  %vm655_vm11 = vweird.f32 %v2048_v12 }
 0x280   :  { %vm656_vm13 = vmor %vm654_vm12, %vm655_vm11 }
 0x281   :  { %v650_v30 = vmul.f32 %v2048_v12, %v649_v18  ;;  %v687_v31 = vsel %vm686_vm10, %v2046_v9, %v683_v5 }
 0x282   :  { %v691_v43 = vmul.f32 %v687_v31, %v29_v13 }
 0x283   :  { %v651_v44 = vmul.f32 0.5, %v650_v30 }
 0x284   :  { %v695_v36 = vmul.f32 %v691_v43, %v2547_v34  ;;  %v2110_v34 = vmov 1  }
 0x285   :  { %v652_v6 = vsub.f32 1.5, %v651_v44  ;;  %1874 = vset.pattern.permute.xlu2 %v2110_v34 }
 0x286   :  { %733 = vperm.xlu1 %1871, %v691_v43   ;;  %706 = vrot.lane.b32.xlu0 %v695_v36, %s2101_s23 }
 0x287   :  { %v653_v38 = vmul.f32 %v2048_v12, %v652_v6 }
 0x289   :  { %v657_v46 = vsel %vm656_vm13, %v2048_v12, %v653_v38 }
 0x28a   :  { %v688_v47 = vmul.f32 %v657_v46, %v26_v39 }
 0x28c   :  { %v692_v50 = vmul.f32 %v688_v47, %v2555_v10 }
 0x28e   :  { %723 = vperm.xlu1 %1871, %v689_v0   ;;  %700 = vrot.lane.b32.xlu0 %v692_v50, %s2101_s23 }
 0x296   :  { %718 = vperm.xlu1 %1871, %v688_v47   ;;  %728 = vperm.xlu0 %1872, %v690_v35  }
 0x29e   :  { %1873 = vset.pattern.permute.xlu0 %v2110_v34 }
 0x2d0   :  { %v703_v51 = vpop.permute.xlu2 %702 }
 0x2d1   :  { %v713_v52 = vsub.f32 %v27_v24, %v703_v51 }
 0x2d3   :  { %751 = vperm.xlu0 %1873, %v713_v52  }
 0x2f0   :  { %v705_v53 = vpop.permute.xlu1 %704 }
 0x2f1   :  { %v714_v54 = vsub.f32 %v28_v32, %v705_v53 }
 0x2f3   :  { %756 = vperm.xlu2 %1874, %v714_v54  }
 0x2f8   :  { %v707_v55 = vpop.permute.xlu0 %706  ;;  %v734_v10 = vpop.permute.xlu1 %733 }
 0x2f9   :  { %v715_v56 = vsub.f32 %v29_v13, %v707_v55  ;;  %v742_v18 = vmul.f32 %v734_v10, %v2515_v57  ;;  %v743_v13 = vmul.f32 %v734_v10, %v2517_v60 }
 0x2fb   :  { %761 = vperm.xlu2 %1874, %v715_v56  }
 0x300   :  { %v701_v58 = vpop.permute.xlu0 %700  ;;  %v724_v62 = vpop.permute.xlu1 %723 }
 0x301   :  { %v712_v59 = vsub.f32 %v26_v39, %v701_v58  ;;  %v738_v3 = vmul.f32 %v724_v62, %v2495_v40  ;;  %v739_v15 = vmul.f32 %v724_v62, %v2497_v41 }
 0x303   :  { %746 = vperm.xlu2 %1874, %v712_v59  }
 0x308   :  { %v729_v61 = vpop.permute.xlu0 %728  ;;  %v719_v35 = vpop.permute.xlu1 %718 }
 0x309   :  { %v740_v0 = vmul.f32 %v729_v61, %v2507_v45  ;;  %v741_v1 = vmul.f32 %v729_v61, %v2509_v49  ;;  %v736_v31 = vmul.f32 %v719_v35, %v2525_v17  ;;  %v737_v36 = vmul.f32 %v719_v35, %v2523_v14 }
 0x345   :  { %v752_v19 = vpop.permute.xlu0 %751 }
 0x346   :  { %v766_v20 = vadd.f32 %v752_v19, %v738_v3  ;;  %v767_v21 = vadd.f32 %v752_v19, %v739_v15 }
 0x348   :  { %v782_v22 = vmin.f32 %v766_v20, 0.0  ;;  %v783_v24 = vmin.f32 %v767_v21, 0.0  ;;  %vm774_vm14 = vcmp.gt.f32.partialorder %v766_v20, 0.0  ;;  %vm775_vm15 = vcmp.gt.f32.partialorder %v767_v21, 0.0 }
 0x34a   :  { %v792_v26 = vmul.f32 1.442695, %v782_v22  ;;  %v794_v27 = vmul.f32 1.442695, %v783_v24 }
 0x34c   :  { %2049 = vpow2.f32 %v792_v26 }
 0x34d   :  { %2051 = vpow2.f32 %v794_v27  ;;  %v757_v2 = vpop.permute.xlu2 %756 }
 0x34e   :  { %v768_v4 = vadd.f32 %v757_v2, %v740_v0  ;;  %v769_v7 = vadd.f32 %v757_v2, %v741_v1 }
 0x350   :  { %v784_v8 = vmin.f32 %v768_v4, 0.0  ;;  %v785_v40 = vmin.f32 %v769_v7, 0.0  ;;  %vm776_vm9 = vcmp.gt.f32.partialorder %v768_v4, 0.0  ;;  %vm777_vm10 = vcmp.gt.f32.partialorder %v769_v7, 0.0 }
 0x352   :  { %v2050_v9 = vpop.eup %2049  ;;  %v796_v41 = vmul.f32 1.442695, %v784_v8  ;;  %v798_v48 = vmul.f32 1.442695, %v785_v40 }
 0x353   :  { %v2052_v63 = vpop.eup %2051  ;;  %v1665_v28 = vadd.f32 -1.0, %v2050_v9 }
 0x354   :  { %v1666_v32 = vadd.f32 -1.0, %v2052_v63  ;;  %2053 = vpow2.f32 %v796_v41 }
 0x355   :  { %v814_v33 = vmul.f32 1.6732632, %v1665_v28  ;;  %2055 = vpow2.f32 %v798_v48  ;;  %v762_v25 = vpop.permute.xlu2 %761 }
 0x356   :  { %v815_v45 = vmul.f32 1.6732632, %v1666_v32  ;;  %v770_v38 = vadd.f32 %v762_v25, %v742_v18  ;;  %v771_v39 = vadd.f32 %v762_v25, %v743_v13 }
 0x357   :  { %v822_v49 = vsel %vm774_vm14, %v766_v20, %v814_v33 }
 0x358   :  { %v823_v37 = vsel %vm775_vm15, %v767_v21, %v815_v45  ;;  %v830_v23 = vmul.f32 1.050701, %v822_v49  ;;  %v786_v17 = vmin.f32 %v770_v38, 0.0  ;;  %v787_v51 = vmin.f32 %v771_v39, 0.0 }
 0x359   :  { %v831_v11 = vmul.f32 1.050701, %v823_v37  ;;  %vm778_vm13 = vcmp.gt.f32.partialorder %v770_v38, 0.0  ;;  %vm779_vm14 = vcmp.gt.f32.partialorder %v771_v39, 0.0 }
 0x35a   :  { %v2054_v12 = vpop.eup %2053  ;;  %v2590_v5 = vmul.f32 %v830_v23, %v2499_v42  ;;  %v800_v58 = vmul.f32 1.442695, %v786_v17  ;;  %v802_v59 = vmul.f32 1.442695, %v787_v51 }
 0x35b   :  { %v2056_v30 = vpop.eup %2055  ;;  %v2594_v43 = vmul.f32 %v831_v11, %v2501_v29  ;;  %v1667_v44 = vadd.f32 -1.0, %v2054_v12 }
 0x35c   :  { %v1668_v6 = vadd.f32 -1.0, %v2056_v30 }
 0x35d   :  { %v747_v46 = vpop.permute.xlu2 %746  ;;  %v2599_v57 = vpack.i.bf16 %v2594_v43, %v2590_v5  ;;  %v816_v60 = vmul.f32 1.6732632, %v1667_v44 }
 0x35e   :  { %v817_v47 = vmul.f32 1.6732632, %v1668_v6  ;;  %v764_v50 = vadd.f32 %v747_v46, %v736_v31  ;;  %v765_v34 = vadd.f32 %v747_v46, %v737_v36 }
 0x35f   :  { %1896 = vrot.lane.b32.xlu0 %v2599_v57, %s2105_s9  ;;  %v824_v53 = vsel %vm776_vm9, %v768_v4, %v816_v60 }
 0x360   :  { %v780_v14 = vmin.f32 %v764_v50, 0.0  ;;  %v781_v52 = vmin.f32 %v765_v34, 0.0  ;;  %v825_v54 = vsel %vm777_vm10, %v769_v7, %v817_v47  ;;  %v832_v10 = vmul.f32 1.050701, %v824_v53 }
 0x361   :  { %v833_v61 = vmul.f32 1.050701, %v825_v54  ;;  %vm772_vm11 = vcmp.gt.f32.partialorder %v764_v50, 0.0  ;;  %vm773_vm12 = vcmp.gt.f32.partialorder %v765_v34, 0.0 }
 0x362   :  { %v788_v55 = vmul.f32 1.442695, %v780_v14  ;;  %v790_v56 = vmul.f32 1.442695, %v781_v52  ;;  %v2606_v62 = vmul.f32 %v832_v10, %v2499_v42 }
 0x363   :  { %v2609_v3 = vmul.f32 %v833_v61, %v2501_v29 }
 0x364   :  { %2057 = vpow2.f32 %v788_v55 }
 0x365   :  { %2059 = vpow2.f32 %v790_v56  ;;  %v1925_v22 = vpack.i.bf16 %v2609_v3, %v2606_v62 }
 0x366   :  { %2061 = vpow2.f32 %v800_v58 }
 0x367   :  { %1901 = vrot.lane.b32.xlu0 %v2599_v57, %s2101_s23  ;;  %2063 = vpow2.f32 %v802_v59 }
 0x36a   :  { %v2058_v15 = vpop.eup %2057 }
 0x36b   :  { %v2060_v19 = vpop.eup %2059  ;;  %v1663_v20 = vadd.f32 -1.0, %v2058_v15 }
 0x36c   :  { %v1664_v21 = vadd.f32 -1.0, %v2060_v19  ;;  %v2062_v24 = vpop.eup %2061 }
 0x36d   :  { %v812_v26 = vmul.f32 1.6732632, %v1663_v20  ;;  %v2064_v27 = vpop.eup %2063  ;;  %v1669_v7 = vadd.f32 -1.0, %v2062_v24 }
 0x36e   :  { %v813_v0 = vmul.f32 1.6732632, %v1664_v21  ;;  %v1670_v8 = vadd.f32 -1.0, %v2064_v27 }
 0x36f   :  { %1926 = vrot.lane.b32.xlu0 %v1925_v22, %s2107_s11  ;;  %v820_v1 = vsel %vm772_vm11, %v764_v50, %v812_v26  ;;  %v818_v48 = vmul.f32 1.6732632, %v1669_v7 }
 0x370   :  { %v821_v2 = vsel %vm773_vm12, %v765_v34, %v813_v0  ;;  %v828_v4 = vmul.f32 1.050701, %v820_v1  ;;  %v819_v63 = vmul.f32 1.6732632, %v1670_v8 }
 0x371   :  { %v829_v40 = vmul.f32 1.050701, %v821_v2  ;;  %v826_v32 = vsel %vm778_vm13, %v770_v38, %v818_v48 }
 0x372   :  { %v2615_v9 = vmul.f32 %v828_v4, %v2499_v42  ;;  %v827_v33 = vsel %vm779_vm14, %v771_v39, %v819_v63  ;;  %v834_v25 = vmul.f32 1.050701, %v826_v32 }
 0x373   :  { %v2618_v41 = vmul.f32 %v829_v40, %v2501_v29  ;;  %v835_v45 = vmul.f32 1.050701, %v827_v33 }
 0x374   :  { %v2629_v49 = vmul.f32 %v834_v25, %v2499_v42 }
 0x375   :  { %v1885_v28 = vpack.i.bf16 %v2618_v41, %v2615_v9  ;;  %v2632_v35 = vmul.f32 %v835_v45, %v2501_v29 }
 0x377   :  { %1931 = vrot.lane.b32.xlu0 %v1925_v22, %s2102_s24  ;;  %1886 = vrot.lane.b32.xlu2 %v1885_v28, %s2107_s11  ;;  %v1995_v37 = vpack.i.bf16 %v2632_v35, %v2629_v49 }
 0x378   :  { %1876 = vrot.lane.b32.xlu1 %v1885_v28, %s2105_s9 }
 0x37f   :  { %1971 = vrot.lane.b32.xlu0 %v1885_v28, %s2108_s12  ;;  %1891 = vrot.lane.b32.xlu2 %v1885_v28, %s2102_s24 }
 0x380   :  { %1881 = vrot.lane.b32.xlu1 %v1885_v28, %s2101_s23 }
 0x387   :  { %1996 = vrot.lane.b32.xlu0 %v1995_v37, %s2108_s12  ;;  %1916 = vrot.lane.b32.xlu2 %v1925_v22, %s2105_s9 }
 0x388   :  { %1906 = vrot.lane.b32.xlu1 %v2599_v57, %s2107_s11 }
 0x38f   :  { %2001 = vrot.lane.b32.xlu0 %v1995_v37, %s2103_s7  ;;  %1921 = vrot.lane.b32.xlu2 %v1925_v22, %s2101_s23 }
 0x390   :  { %1911 = vrot.lane.b32.xlu1 %v2599_v57, %s2102_s24 }
 0x397   :  { %2006 = vrot.lane.b32.xlu0 %v1995_v37, %s2106_s10  ;;  %1951 = vrot.lane.b32.xlu2 %v1995_v37, %s2107_s11 }
 0x398   :  { %1936 = vrot.lane.b32.xlu1 %v1995_v37, %s2105_s9 }
 0x39f   :  { %2011 = vrot.lane.b32.xlu0 %v1885_v28, %s2106_s10  ;;  %1956 = vrot.lane.b32.xlu2 %v1995_v37, %s2102_s24 }
 0x3a0   :  { %1941 = vrot.lane.b32.xlu1 %v1995_v37, %s2101_s23 }
 0x3a7   :  { %2021 = vrot.lane.b32.xlu0 %v2599_v57, %s2104_s8  ;;  %1961 = vrot.lane.b32.xlu2 %v2599_v57, %s2108_s12 }
 0x3a8   :  { %1946 = vrot.lane.b32.xlu1 %v1925_v22, %s2108_s12 }
 0x3af   :  { %1976 = vrot.lane.b32.xlu2 %v2599_v57, %s2103_s7 }
 0x3b0   :  { %1966 = vrot.lane.b32.xlu1 %v1925_v22, %s2103_s7 }
 0x3b7   :  { %1986 = vrot.lane.b32.xlu2 %v1925_v22, %s2106_s10 }
 0x3b8   :  { %1981 = vrot.lane.b32.xlu1 %v1885_v28, %s2103_s7 }
 0x3bf   :  { %2026 = vrot.lane.b32.xlu2 %v1995_v37, %s2104_s8 }
 0x3c0   :  { %1991 = vrot.lane.b32.xlu1 %v2599_v57, %s2106_s10 }
 0x3c7   :  { %2031 = vrot.lane.b32.xlu2 %v1885_v28, %s2104_s8 }
 0x3c8   :  { %2016 = vrot.lane.b32.xlu1 %v1925_v22, %s2104_s8 }
 0x3d1   :  { %v2665_v23 = vpop.permute.xlu2 %1886  ;;  %v2669_v12 = vpop.permute.xlu0 %1896 }
 0x3d2   :  { %v1899_v53 = vunpack.i.h.bf16 %v2669_v12  ;;  %v1898_v54 = vunpack.i.l.bf16 %v2669_v12  ;;  %v3194_v20 = vunpack.i.h.bf16 %v2665_v23  ;;  %v1888_v7 = vunpack.i.l.bf16 %v2665_v23 }
 0x3d4   :  { %v1061_v19 = vsel %vm254_vm2, %v1898_v54, %v1899_v53 }
 0x3d9   :  { %v2667_v11 = vpop.permute.xlu2 %1891  ;;  %v2673_v13 = vpop.permute.xlu0 %1901 }
 0x3da   :  { %v1904_v8 = vunpack.i.h.bf16 %v2673_v13  ;;  %v1903_v40 = vunpack.i.l.bf16 %v2673_v13 }
 0x3e1   :  { %v2671_v18 = vpop.permute.xlu2 %1916  ;;  %v2677_v44 = vpop.permute.xlu0 %1926 }
 0x3e2   :  { %v1919_v17 = vunpack.i.h.bf16 %v2671_v18  ;;  %v1918_v51 = vunpack.i.l.bf16 %v2671_v18  ;;  %v1929_v21 = vunpack.i.h.bf16 %v2677_v44  ;;  %v1928_v22 = vunpack.i.l.bf16 %v2677_v44 }
 0x3e3   :  { %v3197_v44 = vunpack.i.h.bf16 %v2665_v23  ;;  %v1681_v23 = vld [vmem:[%s3190_s1 + $0xb0] sm:$0xff] }
 0x3e4   :  { %v1062_v10 = vsel %vm254_vm2, %v1918_v51, %v1919_v17  ;;  %v1030_v13 = vsel %vm221_vm7, %v1928_v22, %v1929_v21 }
 0x3e9   :  { %v1922_v30 = vpop.permute.xlu2 %1921  ;;  %v2687_v46 = vpop.permute.xlu0 %1931 }
 0x3ea   :  { %v2675_v31 = vpop.permute.xlu1 %1876  ;;  %v1924_v24 = vunpack.i.h.bf16 %v1922_v30  ;;  %v1923_v0 = vunpack.i.l.bf16 %v1922_v30 }
 0x3eb   :  { %v1879_v56 = vunpack.i.h.bf16 %v2675_v31  ;;  %v1878_v58 = vunpack.i.l.bf16 %v2675_v31 }
 0x3ec   :  { %v962_v37 = vsel %vm147_vm0, %v1924_v24, %v1923_v0  ;;  %v958_v30 = vsel %vm147_vm0, %v1923_v0, %v1924_v24  ;;  %v1934_v0 = vunpack.i.h.bf16 %v2687_v46 }
 0x3ed   :  { %v1060_v4 = vsel %vm254_vm2, %v1878_v58, %v1879_v56  ;;  %v1064_v12 = vsel %vm254_vm2, %v1879_v56, %v1878_v58  ;;  %v1678_v58 = vld [vmem:[%s3190_s1 + $0x98] sm:$0xff] }
 0x3f1   :  { %v2679_v36 = vpop.permute.xlu2 %1951  ;;  %v2693_v47 = vpop.permute.xlu0 %1971 }
 0x3f2   :  { %v2681_v6 = vpop.permute.xlu1 %1881  ;;  %v1954_v61 = vunpack.i.h.bf16 %v2679_v36  ;;  %v1953_v15 = vunpack.i.l.bf16 %v2679_v36  ;;  %v1034_v36 = vsel %vm221_vm7, %v1929_v21, %v1928_v22  ;;  %v1032_v21 = vsel %vm221_vm7, %v3197_v44, %v1888_v7 }
 0x3f3   :  { %v1884_v25 = vunpack.i.h.bf16 %v2681_v6  ;;  %v1883_v45 = vunpack.i.l.bf16 %v2681_v6 }
 0x3f4   :  { %v1031_v48 = vsel %vm221_vm7, %v1953_v15, %v1954_v61  ;;  %v1035_v31 = vsel %vm221_vm7, %v1954_v61, %v1953_v15  ;;  %v1677_v15 = vld [vmem:[%s3190_s1 + $0x90] sm:$0xff] }
 0x3f9   :  { %v2683_v38 = vpop.permute.xlu2 %1956  ;;  %v2713_v59 = vpop.permute.xlu0 %1996 }
 0x3fa   :  { %v2685_v39 = vpop.permute.xlu1 %1906  ;;  %v3196_v6 = vunpack.i.l.bf16 %v2713_v59  ;;  %v3198_v22 = vunpack.i.l.bf16 %v2713_v59 }
 0x3fb   :  { %v1909_v63 = vunpack.i.h.bf16 %v2685_v39  ;;  %v1908_v28 = vunpack.i.l.bf16 %v2685_v39  ;;  %v1676_v39 = vld [vmem:[%s3190_s1 + $0x88] sm:$0xff] }
 0x3fd   :  { %v1029_v24 = vsel %vm221_vm7, %v1908_v28, %v1909_v63  ;;  %v1033_v61 = vsel %vm221_vm7, %v1909_v63, %v1908_v28  ;;  %v3199_v63 = vunpack.i.h.bf16 %v2713_v59 }
 0x3ff   :  { %v1003_v28 = vsel %vm188_vm8, %v3199_v63, %v3198_v22 }
 0x401   :  { %v2689_v57 = vpop.permute.xlu2 %1961 }
 0x402   :  { %v2691_v60 = vpop.permute.xlu1 %1911 }
 0x409   :  { %v2695_v50 = vpop.permute.xlu2 %1976 }
 0x40a   :  { %v2697_v34 = vpop.permute.xlu1 %1936 }
 0x40b   :  { %v1939_v14 = vunpack.i.h.bf16 %v2697_v34  ;;  %v1938_v52 = vunpack.i.l.bf16 %v2697_v34  ;;  %v1065_v34 = vsel %vm254_vm2, %v1899_v53, %v1898_v54 }
 0x40d   :  { %v1063_v55 = vsel %vm254_vm2, %v1938_v52, %v1939_v14 }
 0x40e   :  { %1234 = vmatpush.msrb.mxu3 %v1063_v55  ;;  %v3195_v55 = vunpack.i.h.bf16 %v2713_v59 }
 0x410   :  { %1235 = vmatpush.msrb.mxu3 %v1062_v10  ;;  %v1959_v10 = vunpack.i.h.bf16 %v2683_v38 }
 0x411   :  { %v2732_v26 = vpop.permute.xlu2 %1986 }
 0x412   :  { %v1942_v27 = vpop.permute.xlu1 %1941  ;;  %1236 = vmatpush.msrb.mxu3 %v1061_v19  ;;  %v1958_v19 = vunpack.i.l.bf16 %v2683_v38  ;;  %v1028_v38 = vsel %vm221_vm7, %v1888_v7, %v3194_v20  ;;  %v1964_v20 = vunpack.i.h.bf16 %v2689_v57 }
 0x413   :  { %v1944_v1 = vunpack.i.h.bf16 %v1942_v27  ;;  %v1943_v2 = vunpack.i.l.bf16 %v1942_v27  ;;  %v2771_v27 = vpop.permute.xlu0 %2001 }
 0x414   :  { %1237 = vmatpush.msrb.mxu3 %v1060_v4 }
 0x415   :  { %v963_v32 = vsel %vm147_vm0, %v1944_v1, %v1943_v2  ;;  %v959_v33 = vsel %vm147_vm0, %v1943_v2, %v1944_v1  ;;  %v961_v1 = vsel %vm147_vm0, %v1904_v8, %v1903_v40  ;;  %v1933_v2 = vunpack.i.l.bf16 %v2687_v46 }
 0x416   :  { %1205 = vmatpush.msrb.mxu1 %v963_v32  ;;  %1238 = vmatpush.msrb.mxu3 %v1031_v48  ;;  %v957_v32 = vsel %vm147_vm0, %v1903_v40, %v1904_v8  ;;  %v931_v8 = vsel %vm114_vm1, %v1959_v10, %v1958_v19  ;;  %v999_v40 = vsel %vm188_vm8, %v3196_v6, %v3195_v55  ;;  %v1974_v6 = vunpack.i.h.bf16 %v2693_v47 }
 0x417   :  { %1292 = vmatpush.msra.mxu0 %v959_v33  ;;  %v960_v33 = vsel %vm147_vm0, %v1884_v25, %v1883_v45  ;;  %v927_v55 = vsel %vm114_vm1, %v1958_v19, %v1959_v10  ;;  %v926_v10 = vsel %vm114_vm1, %v1933_v2, %v1934_v0  ;;  %v2004_v19 = vunpack.i.h.bf16 %v2771_v27 }
 0x418   :  { %1206 = vmatpush.msrb.mxu1 %v962_v37  ;;  %1239 = vmatpush.msrb.mxu3 %v1030_v13 }
 0x419   :  { %1293 = vmatpush.msra.mxu0 %v958_v30  ;;  %v2789_v4 = vpop.permute.xlu2 %2026 }
 0x41a   :  { %v2791_v48 = vpop.permute.xlu1 %1946  ;;  %1207 = vmatpush.msrb.mxu1 %v961_v1  ;;  %1240 = vmatpush.msrb.mxu3 %v1029_v24  ;;  %v2029_v37 = vunpack.i.h.bf16 %v2789_v4  ;;  %v2028_v13 = vunpack.i.l.bf16 %v2789_v4  ;;  %v956_v1 = vsel %vm147_vm0, %v1883_v45, %v1884_v25  ;;  %v1963_v24 = vunpack.i.l.bf16 %v2689_v57  ;;  %v1679_v57 = vld [vmem:[%s3190_s1 + $0xa0] sm:$0xff] }
 0x41b   :  { %v1949_v30 = vunpack.i.h.bf16 %v2791_v48  ;;  %v1948_v46 = vunpack.i.l.bf16 %v2791_v48  ;;  %1294 = vmatpush.msra.mxu0 %v957_v32  ;;  %v1914_v32 = vunpack.i.h.bf16 %v2691_v60  ;;  %v1894_v45 = vunpack.i.h.bf16 %v2667_v11 }
 0x41c   :  { %1208 = vmatpush.msrb.mxu1 %v960_v33  ;;  %1241 = vmatpush.msrb.mxu3 %v1028_v38  ;;  %v1913_v33 = vunpack.i.l.bf16 %v2691_v60  ;;  %v1095_v25 = vsel %vm287_vm4, %v2028_v13, %v2029_v37  ;;  %v1893_v38 = vunpack.i.l.bf16 %v2667_v11  ;;  %v1973_v60 = vunpack.i.l.bf16 %v2693_v47 }
 0x41d   :  { %1295 = vmatpush.msra.mxu0 %v956_v1  ;;  %1275 = vmatpush.msra.mxu2 %v1095_v25  ;;  %v930_v1 = vsel %vm114_vm1, %v1934_v0, %v1933_v2  ;;  %v998_v11 = vsel %vm188_vm8, %v1948_v46, %v1949_v30  ;;  %v1002_v7 = vsel %vm188_vm8, %v1949_v30, %v1948_v46 }
 0x41e   :  { %1209 = vmatpush.msrb.mxu1 %v931_v8  ;;  %1242 = vmatpush.msrb.mxu3 %v999_v40  ;;  %v2003_v8 = vunpack.i.l.bf16 %v2771_v27  ;;  %v997_v40 = vsel %vm188_vm8, %v1963_v24, %v1964_v20  ;;  %v925_v0 = vsel %vm114_vm1, %v1913_v33, %v1914_v32  ;;  %v928_v27 = vsel %vm114_vm1, %v1894_v45, %v1893_v38 }
 0x41f   :  { %1296 = vmatpush.msra.mxu0 %v927_v55  ;;  %v929_v55 = vsel %vm114_vm1, %v1914_v32, %v1913_v33  ;;  %v1979_v32 = vunpack.i.h.bf16 %v2695_v50  ;;  %v1978_v33 = vunpack.i.l.bf16 %v2695_v50  ;;  %v1001_v59 = vsel %vm188_vm8, %v1964_v20, %v1963_v24 }
 0x420   :  { %1210 = vmatpush.msrb.mxu1 %v930_v1  ;;  %1243 = vmatpush.msrb.mxu3 %v998_v11  ;;  %v996_v11 = vsel %vm188_vm8, %v1973_v60, %v1974_v6  ;;  %v1000_v48 = vsel %vm188_vm8, %v1974_v6, %v1973_v60 }
 0x421   :  { %1297 = vmatpush.msra.mxu0 %v926_v10  ;;  %v2007_v10 = vpop.permute.xlu0 %2006 }
 0x422   :  { %v1967_v25 = vpop.permute.xlu1 %1966  ;;  %1211 = vmatpush.msrb.mxu1 %v929_v55  ;;  %1244 = vmatpush.msrb.mxu3 %v997_v40  ;;  %v924_v55 = vsel %vm114_vm1, %v1893_v38, %v1894_v45  ;;  %v899_v40 = vsel %vm81_vm3, %v2004_v19, %v2003_v8  ;;  %v897_v45 = vsel %vm81_vm3, %v1979_v32, %v1978_v33 }
 0x423   :  { %v1969_v2 = vunpack.i.h.bf16 %v1967_v25  ;;  %v1968_v1 = vunpack.i.l.bf16 %v1967_v25  ;;  %1298 = vmatpush.msra.mxu0 %v925_v0  ;;  %v895_v25 = vsel %vm81_vm3, %v2003_v8, %v2004_v19  ;;  %v2009_v19 = vunpack.i.h.bf16 %v2007_v10 }
 0x424   :  { %1212 = vmatpush.msrb.mxu1 %v928_v27  ;;  %1245 = vmatpush.msrb.mxu3 %v996_v11  ;;  %v2008_v8 = vunpack.i.l.bf16 %v2007_v10 }
 0x425   :  { %1299 = vmatpush.msra.mxu0 %v924_v55  ;;  %v898_v0 = vsel %vm81_vm3, %v1969_v2, %v1968_v1  ;;  %v894_v50 = vsel %vm81_vm3, %v1968_v1, %v1969_v2  ;;  %v1989_v2 = vunpack.i.h.bf16 %v2732_v26  ;;  %v1988_v1 = vunpack.i.l.bf16 %v2732_v26 }
 0x426   :  { %1213 = vmatpush.msrb.mxu1 %v899_v40  ;;  %1246 = vmatpush.msrb.mxu3 %v2629_v49  ;;  %v893_v49 = vsel %vm81_vm3, %v1978_v33, %v1979_v32 }
 0x427   :  { %1300 = vmatpush.msra.mxu0 %v895_v25  ;;  %v866_v26 = vsel %vm48_vm5, %v1989_v2, %v1988_v1  ;;  %v862_v55 = vsel %vm48_vm5, %v1988_v1, %v1989_v2  ;;  %v1066_v1 = vsel %vm254_vm2, %v1919_v17, %v1918_v51  ;;  %v1674_v51 = vld [vmem:[%s3190_s1 + $0x78] sm:$0xff] }
 0x428   :  { %1214 = vmatpush.msrb.mxu1 %v898_v0  ;;  %1247 = vmatpush.msrb.mxu3 %v2606_v62  ;;  %v1099_v62 = vsel %vm287_vm4, %v2029_v37, %v2028_v13  ;;  %v867_v37 = vsel %vm48_vm5, %v2009_v19, %v2008_v8  ;;  %v863_v13 = vsel %vm48_vm5, %v2008_v8, %v2009_v19 }
 0x429   :  { %1301 = vmatpush.msra.mxu0 %v894_v50  ;;  %v2012_v4 = vpop.permute.xlu0 %2011  ;;  %v2906_v50 = vld [vmem:[%s3190_s1 + $0x80] sm:$0xff] }
 0x42a   :  { %v1982_v38 = vpop.permute.xlu1 %1981  ;;  %1215 = vmatpush.msrb.mxu1 %v897_v45  ;;  %1248 = vmatpush.msrb.mxu3 %v2590_v5  ;;  %v2886_v5 = vld [vmem:[%s3190_s1 + $0x68] sm:$0xff]  ;;  %v2014_v33 = vunpack.i.h.bf16 %v2012_v4  ;;  %v2013_v40 = vunpack.i.l.bf16 %v2012_v4 }
 0x42b   :  { %v1984_v27 = vunpack.i.h.bf16 %v1982_v38  ;;  %v1983_v11 = vunpack.i.l.bf16 %v1982_v38  ;;  %1302 = vmatpush.msra.mxu0 %v893_v49  ;;  %v1671_v49 = vld [vmem:[%s3190_s1 + $0x60] sm:$0xff] }
 0x42c   :  { %1249 = vmatpush.msrb.mxu3 %v2615_v9  ;;  %v864_v19 = vsel %vm48_vm5, %v2014_v33, %v2013_v40  ;;  %v860_v8 = vsel %vm48_vm5, %v2013_v40, %v2014_v33 }
 0x42d   :  { %v896_v9 = vsel %vm81_vm3, %v1984_v27, %v1983_v11  ;;  %v892_v10 = vsel %vm81_vm3, %v1983_v11, %v1984_v27  ;;  %1250 = vmatmul.f32.vlgmr.msrb.gmra.mxu3 %v2886_v5  ;;  %v1067_v11 = vsel %vm254_vm2, %v1939_v14, %v1938_v52 }
 0x42e   :  { %1362 = vmatpush.msra.mxu3 %v1099_v62  ;;  %1216 = vmatpush.msrb.mxu1 %v896_v9  ;;  %v2032_v62 = vpop.permute.xlu2 %2031 }
 0x42f   :  { %1303 = vmatpush.msra.mxu0 %v892_v10  ;;  %v2034_v14 = vunpack.i.h.bf16 %v2032_v62  ;;  %v2033_v52 = vunpack.i.l.bf16 %v2032_v62 }
 0x430   :  { %1217 = vmatpush.msrb.mxu1 %v867_v37 }
 0x431   :  { %1304 = vmatpush.msra.mxu0 %v863_v13  ;;  %v2022_v27 = vpop.permute.xlu0 %2021  ;;  %v1673_v13 = vld [vmem:[%s3190_s1 + $0x70] sm:$0xff]  ;;  %v1092_v56 = vsel %vm287_vm4, %v2033_v52, %v2034_v14 }
 0x432   :  { %v1992_v32 = vpop.permute.xlu1 %1991  ;;  %1218 = vmatpush.msrb.mxu1 %v866_v26  ;;  %v2024_v9 = vunpack.i.h.bf16 %v2022_v27  ;;  %v2023_v10 = vunpack.i.l.bf16 %v2022_v27  ;;  %v1096_v26 = vsel %vm287_vm4, %v2034_v14, %v2033_v52 }
 0x433   :  { %1305 = vmatpush.msra.mxu0 %v862_v55  ;;  %v1994_v25 = vunpack.i.h.bf16 %v1992_v32  ;;  %v1993_v0 = vunpack.i.l.bf16 %v1992_v32  ;;  %v1680_v55 = vld [vmem:[%s3190_s1 + $0xa8] sm:$0xff] }
 0x434   :  { %v1093_v53 = vsel %vm287_vm4, %v2023_v10, %v2024_v9  ;;  %v1097_v54 = vsel %vm287_vm4, %v2024_v9, %v2023_v10 }
 0x435   :  { %v865_v45 = vsel %vm48_vm5, %v1994_v25, %v1993_v0  ;;  %v861_v38 = vsel %vm48_vm5, %v1993_v0, %v1994_v25  ;;  %1253 = vmatmul.f32.gmra.mxu3 %v2906_v50 }
 0x436   :  { %1219 = vmatpush.msrb.mxu1 %v865_v45  ;;  %1306 = vmatpush.msra.mxu0 %v861_v38 }
 0x438   :  { %1220 = vmatpush.msrb.mxu1 %v864_v19  ;;  %1307 = vmatpush.msra.mxu0 %v860_v8 }
 0x439   :  { %1221 = vmatmul.f32.vlgmr.msrb.gmra.mxu1 %v1671_v49  ;;  %1308 = vmatmul.f32.vlgmr.msra.gmra.mxu0 %v1671_v49 }
 0x43a   :  { %1321 = vmatpush.msra.mxu1 %v1067_v11  ;;  %v2017_v2 = vpop.permute.xlu1 %2016 }
 0x43b   :  { %v2019_v4 = vunpack.i.h.bf16 %v2017_v2  ;;  %v2018_v37 = vunpack.i.l.bf16 %v2017_v2 }
 0x43c   :  { %1322 = vmatpush.msra.mxu1 %v1066_v1 }
 0x43d   :  { %v1094_v18 = vsel %vm287_vm4, %v2018_v37, %v2019_v4  ;;  %v1098_v17 = vsel %vm287_vm4, %v2019_v4, %v2018_v37  ;;  %1256 = vmatmul.f32.gmra.mxu3 %v1678_v58 }
 0x43e   :  { %1323 = vmatpush.msra.mxu1 %v1065_v34  ;;  %1276 = vmatpush.msra.mxu2 %v1094_v18 }
 0x43f   :  { %1363 = vmatpush.msra.mxu3 %v1098_v17 }
 0x440   :  { %1324 = vmatpush.msra.mxu1 %v1064_v12  ;;  %1277 = vmatpush.msra.mxu2 %v1093_v53 }
 0x441   :  { %1364 = vmatpush.msra.mxu3 %v1097_v54  ;;  %1224 = vmatmul.f32.gmra.mxu1 %v1674_v51 }
 0x442   :  { %1325 = vmatpush.msra.mxu1 %v1035_v31  ;;  %1278 = vmatpush.msra.mxu2 %v1092_v56 }
 0x443   :  { %1365 = vmatpush.msra.mxu3 %v1096_v26  ;;  %1683 = vmatmul.msk.f32.vlgmr.msra.gmra.mxu2 %vm388_vm6, %v1673_v13 }
 0x444   :  { %1326 = vmatpush.msra.mxu1 %v1034_v36  ;;  %1311 = vmatmul.f32.gmra.mxu0 %v1674_v51 }
 0x445   :  { %1259 = vmatmul.f32.gmra.mxu3 %v1681_v23 }
 0x446   :  { %1327 = vmatpush.msra.mxu1 %v1033_v61 }
 0x448   :  { %1328 = vmatpush.msra.mxu1 %v1032_v21 }
 0x449   :  { %1227 = vmatmul.f32.gmra.mxu1 %v1677_v15 }
 0x44a   :  { %1329 = vmatpush.msra.mxu1 %v1003_v28 }
 0x44b   :  { %1684 = vmatmul.msk.f32.gmra.mxu2 %vm388_vm6, %v1676_v39 }
 0x44c   :  { %1330 = vmatpush.msra.mxu1 %v1002_v7  ;;  %1314 = vmatmul.f32.gmra.mxu0 %v1677_v15 }
 0x44d   :  { %1687 = vmatmul.msk.f32.vlgmr.msra.gmra.mxu3 %vm388_vm6, %v1673_v13 }
 0x44e   :  { %1331 = vmatpush.msra.mxu1 %v1001_v59 }
 0x450   :  { %1332 = vmatpush.msra.mxu1 %v1000_v48 }
 0x451   :  { %1230 = vmatmul.f32.gmra.mxu1 %v1680_v55 }
 0x452   :  { %1333 = vmatpush.msra.mxu1 %v2632_v35 }
 0x453   :  { %1685 = vmatmul.msk.f32.gmra.mxu2 %vm388_vm6, %v1679_v57 }
 0x454   :  { %1334 = vmatpush.msra.mxu1 %v2609_v3  ;;  %1317 = vmatmul.f32.gmra.mxu0 %v1680_v55 }
 0x455   :  { %1688 = vmatmul.msk.f32.gmra.mxu3 %vm388_vm6, %v1676_v39 }
 0x456   :  { %1335 = vmatpush.msra.mxu1 %v2594_v43 }
 0x458   :  { %1336 = vmatpush.msra.mxu1 %v2618_v41 }
 0x459   :  { %1337 = vmatmul.f32.vlgmr.msra.gmra.mxu1 %v2886_v5 }
 0x45b   :  { %1686 = vmatmul.msk.f32.gmra.mxu2 %vm388_vm6, %v1682_v16 }
 0x45d   :  { %1689 = vmatmul.msk.f32.gmra.mxu3 %vm388_vm6, %v1679_v57 }
 0x461   :  { %1340 = vmatmul.f32.gmra.mxu1 %v2906_v50 }
 0x465   :  { %1690 = vmatmul.msk.f32.gmra.mxu3 %vm388_vm6, %v1682_v16 }
 0x469   :  { %1343 = vmatmul.f32.gmra.mxu1 %v1678_v58 }
 0x471   :  { %1346 = vmatmul.f32.gmra.mxu1 %v1681_v23 }
 0x4b0   :  { %v1251_v43 = vpop.f32.mrf.mxu3 }
 0x4b6   :  { %v1222_v3 = vpop.f32.mrf.mxu1  ;;  %v1309_v6 = vpop.f32.mrf.mxu0 }
 0x4b7   :  { %v1252_v60 = vadd.f32 %v1251_v43, %v1222_v3 }
 0x4b8   :  { %v1254_v41 = vpop.f32.mrf.mxu3 }
 0x4be   :  { %v1225_v35 = vpop.f32.mrf.mxu1 }
 0x4bf   :  { %v1255_v49 = vadd.f32 %v1254_v41, %v1225_v35 }
 0x4c0   :  { %v1257_v20 = vpop.f32.mrf.mxu3 }
 0x4c1   :  { %v1312_v0 = vpop.f32.mrf.mxu0 }
 0x4c6   :  { %v1228_v47 = vpop.f32.mrf.mxu1  ;;  %v1280_v30 = vpop.f32.mrf.mxu2 }
 0x4c7   :  { %v3045_v32 = vadd.f32 %v1280_v30, %v1252_v60  ;;  %v1258_v37 = vadd.f32 %v1257_v20, %v1228_v47 }
 0x4c8   :  { %v1260_v24 = vpop.f32.mrf.mxu3 }
 0x4c9   :  { %v1379_v45 = vmul.f32 %v3045_v32, %v2499_v42  ;;  %v1315_v9 = vpop.f32.mrf.mxu0 }
 0x4ce   :  { %v1231_v46 = vpop.f32.mrf.mxu1  ;;  %v1283_v25 = vpop.f32.mrf.mxu2 }
 0x4cf   :  { %v3053_v27 = vadd.f32 %v1283_v25, %v1255_v49  ;;  %v1261_v31 = vadd.f32 %v1260_v24, %v1231_v46 }
 0x4d0   :  { %v1367_v40 = vpop.f32.mrf.mxu3 }
 0x4d1   :  { %v1381_v10 = vmul.f32 %v3053_v27, %v2499_v42  ;;  %v1318_v13 = vpop.f32.mrf.mxu0 }
 0x4d6   :  { %v1338_v5 = vpop.f32.mrf.mxu1  ;;  %v1286_v1 = vpop.f32.mrf.mxu2 }
 0x4d7   :  { %v1339_v33 = vadd.f32 %v1338_v5, %v1309_v6  ;;  %v3061_v52 = vadd.f32 %v1286_v1, %v1258_v37 }
 0x4d8   :  { %v1370_v62 = vpop.f32.mrf.mxu3 }
 0x4d9   :  { %v3047_v50 = vadd.f32 %v1367_v40, %v1339_v33  ;;  %v1383_v12 = vmul.f32 %v3061_v52, %v2499_v42 }
 0x4db   :  { %v1380_v38 = vmul.f32 %v3047_v50, %v2501_v29 }
 0x4dd   :  { %v1387_v19 = vadd.f32 %v1380_v38, %v1379_v45 }
 0x4de   :  { %v1341_v8 = vpop.f32.mrf.mxu1  ;;  %v1289_v54 = vpop.f32.mrf.mxu2 }
 0x4df   :  { %v1342_v11 = vadd.f32 %v1341_v8, %v1312_v0  ;;  %1388 = vadd.xlane.f32.xlu1 %v1387_v19  ;;  %v3069_v26 = vadd.f32 %v1289_v54, %v1261_v31 }
 0x4e0   :  { %v1373_v17 = vpop.f32.mrf.mxu3 }
 0x4e1   :  { %v3055_v2 = vadd.f32 %v1370_v62, %v1342_v11  ;;  %v1385_v44 = vmul.f32 %v3069_v26, %v2499_v42 }
 0x4e3   :  { %v1382_v4 = vmul.f32 %v3055_v2, %v2501_v29 }
 0x4e5   :  { %v1390_v34 = vadd.f32 %v1382_v4, %v1381_v10 }
 0x4e6   :  { %v1344_v14 = vpop.f32.mrf.mxu1 }
 0x4e7   :  { %v1345_v18 = vadd.f32 %v1344_v14, %v1315_v9  ;;  %1391 = vadd.xlane.f32.xlu0 %v1390_v34 }
 0x4e8   :  { %v1376_v61 = vpop.f32.mrf.mxu3 }
 0x4e9   :  { %v3063_v51 = vadd.f32 %v1373_v17, %v1345_v18 }
 0x4eb   :  { %v1384_v53 = vmul.f32 %v3063_v51, %v2501_v29 }
 0x4ed   :  { %v1393_v56 = vadd.f32 %v1384_v53, %v1383_v12  ;;  %v2111_v53 = vmov 2  }
 0x4ee   :  { %v1347_v58 = vpop.f32.mrf.mxu1  ;;  %2036 = vset.pattern.permute.xlu1 %v2111_v53  ;;  %2035 = vset.pattern.permute.xlu0 %v2111_v53 }
 0x4ef   :  { %v1348_v36 = vadd.f32 %v1347_v58, %v1318_v13  ;;  %1394 = vadd.xlane.f32.xlu2 %v1393_v56 }
 0x4f0   :  { %2037 = vset.pattern.permute.xlu2 %v2111_v53 }
 0x4f1   :  { %v3071_v15 = vadd.f32 %v1376_v61, %v1348_v36 }
 0x4f3   :  { %v1386_v21 = vmul.f32 %v3071_v15, %v2501_v29 }
 0x4f5   :  { %v1396_v39 = vadd.f32 %v1386_v21, %v1385_v44 }
 0x4f7   :  { %1397 = vadd.xlane.f32.xlu1 %v1396_v39 }
 0x552   :  { %v1389_v22 = vpop.xlane.xlu1 %1388 }
 0x553   :  { %v3077_v63 = vmul.f32 0.0078125, %v1389_v22  ;;  %v2089_v22 = vld [vmem:[%s3192_s2] sm:$0xff] }
 0x555   :  { %v1403_v28 = vsub.f32 %v3045_v32, %v3077_v63  ;;  %v1404_v23 = vsub.f32 %v3047_v50, %v3077_v63 }
 0x557   :  { %v1411_v7 = vmul.f32 %v1403_v28, %v2499_v42  ;;  %v1412_v59 = vmul.f32 %v1404_v23, %v2501_v29 }
 0x559   :  { %v1419_v55 = vmul.f32 %v1411_v7, %v1411_v7  ;;  %v1420_v48 = vmul.f32 %v1412_v59, %v1412_v59 }
 0x55a   :  { %v1392_v57 = vpop.xlane.xlu0 %1391 }
 0x55b   :  { %v3085_v16 = vmul.f32 0.0078125, %v1392_v57  ;;  %v1427_v43 = vadd.f32 %v1420_v48, %v1419_v55 }
 0x55d   :  { %v1405_v3 = vsub.f32 %v3053_v27, %v3085_v16  ;;  %v1406_v41 = vsub.f32 %v3055_v2, %v3085_v16  ;;  %1428 = vadd.xlane.f32.xlu0 %v1427_v43 }
 0x55f   :  { %v1413_v35 = vmul.f32 %v1405_v3, %v2499_v42  ;;  %v1414_v47 = vmul.f32 %v1406_v41, %v2501_v29 }
 0x561   :  { %v1421_v20 = vmul.f32 %v1413_v35, %v1413_v35  ;;  %v1422_v6 = vmul.f32 %v1414_v47, %v1414_v47 }
 0x562   :  { %v1395_v30 = vpop.xlane.xlu2 %1394 }
 0x563   :  { %v3093_v46 = vmul.f32 0.0078125, %v1395_v30  ;;  %v1430_v24 = vadd.f32 %v1422_v6, %v1421_v20  ;;  %v2090_v20 = vld [vmem:[%s3192_s2 + $0x8] sm:$0xff] }
 0x565   :  { %v1407_v60 = vsub.f32 %v3061_v52, %v3093_v46  ;;  %v1408_v5 = vsub.f32 %v3063_v51, %v3093_v46  ;;  %1431 = vadd.xlane.f32.xlu2 %v1430_v24 }
 0x567   :  { %v1415_v33 = vmul.f32 %v1407_v60, %v2499_v42  ;;  %v1416_v40 = vmul.f32 %v1408_v5, %v2501_v29 }
 0x569   :  { %v1423_v25 = vmul.f32 %v1415_v33, %v1415_v33  ;;  %v1424_v0 = vmul.f32 %v1416_v40, %v1416_v40 }
 0x56a   :  { %v1398_v45 = vpop.xlane.xlu1 %1397 }
 0x56b   :  { %v3101_v38 = vmul.f32 0.0078125, %v1398_v45  ;;  %v1433_v49 = vadd.f32 %v1424_v0, %v1423_v25  ;;  %v2091_v0 = vld [vmem:[%s3192_s2 + $0x10] sm:$0xff] }
 0x56d   :  { %v1409_v19 = vsub.f32 %v3069_v26, %v3101_v38  ;;  %v1410_v8 = vsub.f32 %v3071_v15, %v3101_v38  ;;  %1434 = vadd.xlane.f32.xlu1 %v1433_v49 }
 0x56f   :  { %v1417_v11 = vmul.f32 %v1409_v19, %v2499_v42  ;;  %v1418_v62 = vmul.f32 %v1410_v8, %v2501_v29 }
 0x571   :  { %v1425_v1 = vmul.f32 %v1417_v11, %v1417_v11  ;;  %v1426_v9 = vmul.f32 %v1418_v62, %v1418_v62  ;;  %v2092_v62 = vld [vmem:[%s3192_s2 + $0x18] sm:$0xff] }
 0x573   :  { %v1436_v10 = vadd.f32 %v1426_v9, %v1425_v1 }
 0x575   :  { %1437 = vadd.xlane.f32.xlu0 %v1436_v10 }
 0x5d0   :  { %v1429_v4 = vpop.xlane.xlu0 %1428 }
 0x5d1   :  { %v1439_v37 = vmul.f32 0.0078125, %v1429_v4 }
 0x5d3   :  { %v1443_v34 = vadd.f32 1e-05, %v1439_v37 }
 0x5d5   :  { %2065 = vrsqrt.f32 %v1443_v34  ;;  %vm1453_vm1 = vweird.f32 %v1443_v34 }
 0x5d8   :  { %v1432_v14 = vpop.xlane.xlu2 %1431 }
 0x5d9   :  { %v1440_v18 = vmul.f32 0.0078125, %v1432_v14 }
 0x5db   :  { %v2066_v17 = vpop.eup %2065  ;;  %v1444_v12 = vadd.f32 1e-05, %v1440_v18 }
 0x5dc   :  { %v1448_v54 = vmul.f32 %v2066_v17, %v1443_v34  ;;  %vm1454_vm0 = vweird.f32 %v2066_v17 }
 0x5dd   :  { %2067 = vrsqrt.f32 %v1444_v12  ;;  %vm1455_vm2 = vmor %vm1453_vm1, %vm1454_vm0  ;;  %vm1463_vm4 = vweird.f32 %v1444_v12 }
 0x5de   :  { %v1449_v42 = vmul.f32 %v2066_v17, %v1448_v54 }
 0x5e0   :  { %v1450_v29 = vmul.f32 0.5, %v1449_v42  ;;  %v1435_v13 = vpop.xlane.xlu1 %1434 }
 0x5e1   :  { %v1441_v31 = vmul.f32 0.0078125, %v1435_v13 }
 0x5e2   :  { %v1451_v56 = vsub.f32 1.5, %v1450_v29 }
 0x5e3   :  { %v2068_v58 = vpop.eup %2067  ;;  %v1445_v36 = vadd.f32 1e-05, %v1441_v31 }
 0x5e4   :  { %v1452_v61 = vmul.f32 %v2066_v17, %v1451_v56  ;;  %v1458_v44 = vmul.f32 %v2068_v58, %v1444_v12  ;;  %vm1464_vm3 = vweird.f32 %v2068_v58  ;;  %v2093_v56 = vld [vmem:[%s3189_s0] sm:$0xff] }
 0x5e5   :  { %2069 = vrsqrt.f32 %v1445_v36  ;;  %vm1465_vm5 = vmor %vm1463_vm4, %vm1464_vm3  ;;  %vm1473_vm7 = vweird.f32 %v1445_v36 }
 0x5e6   :  { %v1459_v21 = vmul.f32 %v2068_v58, %v1458_v44  ;;  %v1456_v39 = vsel %vm1455_vm2, %v2066_v17, %v1452_v61 }
 0x5e7   :  { %v1487_v28 = vmul.f32 %v2089_v22, %v1456_v39 }
 0x5e8   :  { %v1460_v23 = vmul.f32 0.5, %v1459_v21  ;;  %v1438_v7 = vpop.xlane.xlu0 %1437 }
 0x5e9   :  { %v1442_v59 = vmul.f32 0.0078125, %v1438_v7  ;;  %v1491_v55 = vmul.f32 %v1487_v28, %v3077_v63 }
 0x5ea   :  { %v1461_v48 = vsub.f32 1.5, %v1460_v23 }
 0x5eb   :  { %v2070_v57 = vpop.eup %2069  ;;  %v1446_v43 = vadd.f32 1e-05, %v1442_v59  ;;  %1499 = vrot.lane.b32.xlu2 %v1491_v55, %s2101_s23 }
 0x5ec   :  { %v1462_v3 = vmul.f32 %v2068_v58, %v1461_v48  ;;  %v1468_v41 = vmul.f32 %v2070_v57, %v1445_v36  ;;  %vm1474_vm6 = vweird.f32 %v2070_v57  ;;  %v2094_v36 = vld [vmem:[%s3189_s0 + $0x8] sm:$0xff] }
 0x5ed   :  { %2071 = vrsqrt.f32 %v1446_v43  ;;  %vm1475_vm8 = vmor %vm1473_vm7, %vm1474_vm6  ;;  %vm1483_vm9 = vweird.f32 %v1446_v43 }
 0x5ee   :  { %v1469_v35 = vmul.f32 %v2070_v57, %v1468_v41  ;;  %v1466_v47 = vsel %vm1465_vm5, %v2068_v58, %v1462_v3 }
 0x5ef   :  { %v1488_v6 = vmul.f32 %v2090_v20, %v1466_v47 }
 0x5f0   :  { %v1470_v30 = vmul.f32 0.5, %v1469_v35 }
 0x5f1   :  { %v1492_v63 = vmul.f32 %v1488_v6, %v3085_v16 }
 0x5f2   :  { %v1471_v24 = vsub.f32 1.5, %v1470_v30 }
 0x5f3   :  { %v2072_v60 = vpop.eup %2071  ;;  %1501 = vrot.lane.b32.xlu1 %v1492_v63, %s2101_s23  ;;  %v2095_v63 = vld [vmem:[%s3189_s0 + $0x30] sm:$0xff] }
 0x5f4   :  { %v1472_v5 = vmul.f32 %v2070_v57, %v1471_v24  ;;  %v1478_v33 = vmul.f32 %v2072_v60, %v1446_v43  ;;  %vm1484_vm15 = vweird.f32 %v2072_v60 }
 0x5f5   :  { %vm1485_vm10 = vmor %vm1483_vm9, %vm1484_vm15 }
 0x5f6   :  { %v1479_v40 = vmul.f32 %v2072_v60, %v1478_v33  ;;  %v1476_v25 = vsel %vm1475_vm8, %v2070_v57, %v1472_v5 }
 0x5f7   :  { %v1489_v45 = vmul.f32 %v2091_v0, %v1476_v25 }
 0x5f8   :  { %v1480_v49 = vmul.f32 0.5, %v1479_v40 }
 0x5f9   :  { %v1493_v19 = vmul.f32 %v1489_v45, %v3093_v46  ;;  %v2112_v46 = vmov 3  }
 0x5fa   :  { %v1481_v16 = vsub.f32 1.5, %v1480_v49 }
 0x5fb   :  { %1522 = vperm.xlu1 %2036, %v1488_v6   ;;  %1503 = vrot.lane.b32.xlu0 %v1493_v19, %s2101_s23 }
 0x5fc   :  { %v1482_v8 = vmul.f32 %v2072_v60, %v1481_v16 }
 0x5fe   :  { %v1486_v11 = vsel %vm1485_vm10, %v2072_v60, %v1482_v8 }
 0x5ff   :  { %v1490_v1 = vmul.f32 %v2092_v62, %v1486_v11 }
 0x601   :  { %v1494_v9 = vmul.f32 %v1490_v1, %v3101_v38 }
 0x603   :  { %1532 = vperm.xlu1 %2036, %v1490_v1   ;;  %1505 = vrot.lane.b32.xlu2 %v1494_v9, %s2101_s23 }
 0x604   :  { %1517 = vperm.xlu0 %2035, %v1487_v28  }
 0x60b   :  { %1527 = vperm.xlu2 %2037, %v1489_v45   ;;  %2040 = vset.pattern.permute.xlu1 %v2112_v46 }
 0x60c   :  { %2039 = vset.pattern.permute.xlu0 %v2112_v46 }
 0x613   :  { %2038 = vset.pattern.permute.xlu2 %v2112_v46 }
 0x645   :  { %v1500_v10 = vpop.permute.xlu2 %1499 }
 0x646   :  { %v1511_v4 = vsub.f32 %v2089_v22, %v1500_v10 }
 0x648   :  { %1545 = vperm.xlu2 %2038, %v1511_v4  }
 0x65d   :  { %v1506_v37 = vpop.permute.xlu2 %1505 }
 0x65e   :  { %v1514_v34 = vsub.f32 %v2092_v62, %v1506_v37 }
 0x660   :  { %1560 = vperm.xlu2 %2038, %v1514_v34   ;;  %v2097_v34 = vld [vmem:[%s3189_s0 + $0x10] sm:$0xff] }
 0x665   :  { %v1502_v14 = vpop.permute.xlu1 %1501  ;;  %v3129_v12 = vpop.permute.xlu2 %1527 }
 0x666   :  { %v1512_v18 = vsub.f32 %v2090_v20, %v1502_v14 }
 0x668   :  { %1550 = vperm.xlu0 %2039, %v1512_v18   ;;  %v2098_v18 = vld [vmem:[%s3189_s0 + $0x18] sm:$0xff] }
 0x66d   :  { %v1504_v17 = vpop.permute.xlu0 %1503 }
 0x66e   :  { %v1513_v38 = vsub.f32 %v2091_v0, %v1504_v17 }
 0x670   :  { %1555 = vperm.xlu1 %2040, %v1513_v38  }
 0x676   :  { %v1518_v53 = vpop.permute.xlu0 %1517 }
 0x677   :  { %v1535_v54 = vmul.f32 %v1518_v53, %v3045_v32  ;;  %v1536_v42 = vmul.f32 %v1518_v53, %v3047_v50  ;;  %v1523_v32 = vpop.permute.xlu1 %1522 }
 0x678   :  { %v1537_v9 = vmul.f32 %v1523_v32, %v3053_v27  ;;  %v1538_v46 = vmul.f32 %v1523_v32, %v3055_v2  ;;  %v1539_v27 = vmul.f32 %v3129_v12, %v3061_v52  ;;  %v1540_v2 = vmul.f32 %v3129_v12, %v3063_v51 }
 0x67f   :  { %v1533_v48 = vpop.permute.xlu1 %1532 }
 0x680   :  { %v1541_v35 = vmul.f32 %v1533_v48, %v3069_v26  ;;  %v1542_v47 = vmul.f32 %v1533_v48, %v3071_v15  ;;  %v2096_v26 = vld [vmem:[%s3189_s0 + $0x38] sm:$0xff] }
 0x6a2   :  { %v1546_v29 = vpop.permute.xlu2 %1545 }
 0x6a3   :  { %v1563_v13 = vadd.f32 %v1546_v29, %v1535_v54  ;;  %v1564_v31 = vadd.f32 %v1546_v29, %v1536_v42 }
 0x6a5   :  { %v1571_v58 = vadd.f32 %v2093_v56, %v1563_v13  ;;  %v1572_v61 = vadd.f32 %v2094_v36, %v1564_v31  ;;  %v2099_v56 = vld [vmem:[%s3189_s0 + $0x20] sm:$0xff]  ;;  %v2100_v36 = vld [vmem:[%s3189_s0 + $0x28] sm:$0xff] }
 0x6a7   :  { %v1587_v44 = vmin.f32 %v1571_v58, 0.0  ;;  %v1588_v21 = vmin.f32 %v1572_v61, 0.0  ;;  %vm1579_vm11 = vcmp.gt.f32.partialorder %v1571_v58, 0.0  ;;  %vm1580_vm12 = vcmp.gt.f32.partialorder %v1572_v61, 0.0 }
 0x6a9   :  { %v1595_v39 = vmul.f32 1.442695, %v1587_v44  ;;  %v1597_v22 = vmul.f32 1.442695, %v1588_v21 }
 0x6ab   :  { %2073 = vpow2.f32 %v1595_v39 }
 0x6ac   :  { %2075 = vpow2.f32 %v1597_v22 }
 0x6b1   :  { %v2074_v50 = vpop.eup %2073 }
 0x6b2   :  { %v2076_v28 = vpop.eup %2075  ;;  %v1691_v23 = vadd.f32 -1.0, %v2074_v50 }
 0x6b3   :  { %v1692_v7 = vadd.f32 -1.0, %v2076_v28 }
 0x6b4   :  { %v1619_v59 = vmul.f32 1.6732632, %v1691_v23 }
 0x6b5   :  { %v1620_v55 = vmul.f32 1.6732632, %v1692_v7 }
 0x6b6   :  { %v1627_v57 = vsel %vm1579_vm11, %v1571_v58, %v1619_v59 }
 0x6b7   :  { %v1628_v43 = vsel %vm1580_vm12, %v1572_v61, %v1620_v55  ;;  %v1635_v3 = vmul.f32 1.050701, %v1627_v57 }
 0x6b8   :  { %v1636_v41 = vmul.f32 1.050701, %v1628_v43 }
 0x6b9   :  { %1643 = vst [vmem:[%s3193_s4] sm:$0xff] %v1635_v3 }
 0x6ba   :  { %1644 = vst [vmem:[%s3193_s4 + $0x8] sm:$0xff] %v1636_v41  ;;  %v1561_v20 = vpop.permute.xlu2 %1560 }
 0x6bb   :  { %v1569_v6 = vadd.f32 %v1561_v20, %v1541_v35  ;;  %v1570_v30 = vadd.f32 %v1561_v20, %v1542_v47 }
 0x6bd   :  { %v1577_v24 = vadd.f32 %v2095_v63, %v1569_v6  ;;  %v1578_v15 = vadd.f32 %v2096_v26, %v1570_v30 }
 0x6bf   :  { %v1593_v60 = vmin.f32 %v1577_v24, 0.0  ;;  %v1594_v5 = vmin.f32 %v1578_v15, 0.0  ;;  %vm1585_vm13 = vcmp.gt.f32.partialorder %v1577_v24, 0.0  ;;  %vm1586_vm14 = vcmp.gt.f32.partialorder %v1578_v15, 0.0 }
 0x6c1   :  { %v1607_v33 = vmul.f32 1.442695, %v1593_v60  ;;  %v1609_v40 = vmul.f32 1.442695, %v1594_v5 }
 0x6c3   :  { %2077 = vpow2.f32 %v1607_v33 }
 0x6c4   :  { %2079 = vpow2.f32 %v1609_v40 }
 0x6c9   :  { %v2078_v25 = vpop.eup %2077 }
 0x6ca   :  { %v2080_v0 = vpop.eup %2079  ;;  %v1697_v45 = vadd.f32 -1.0, %v2078_v25 }
 0x6cb   :  { %v1698_v49 = vadd.f32 -1.0, %v2080_v0 }
 0x6cc   :  { %v1625_v19 = vmul.f32 1.6732632, %v1697_v45 }
 0x6cd   :  { %v1626_v16 = vmul.f32 1.6732632, %v1698_v49 }
 0x6ce   :  { %v1633_v8 = vsel %vm1585_vm13, %v1577_v24, %v1625_v19 }
 0x6cf   :  { %v1634_v11 = vsel %vm1586_vm14, %v1578_v15, %v1626_v16  ;;  %v1641_v62 = vmul.f32 1.050701, %v1633_v8 }
 0x6d0   :  { %v1642_v1 = vmul.f32 1.050701, %v1634_v11 }
 0x6d1   :  { %1649 = vst [vmem:[%s3193_s4 + $0x30] sm:$0xff] %v1641_v62 }
 0x6d2   :  { %1650 = vst [vmem:[%s3193_s4 + $0x38] sm:$0xff] %v1642_v1 }
 0x6da   :  { %v1551_v10 = vpop.permute.xlu0 %1550 }
 0x6db   :  { %v1565_v4 = vadd.f32 %v1551_v10, %v1537_v9  ;;  %v1566_v37 = vadd.f32 %v1551_v10, %v1538_v46 }
 0x6dd   :  { %v1573_v14 = vadd.f32 %v2097_v34, %v1565_v4  ;;  %v1574_v17 = vadd.f32 %v2098_v18, %v1566_v37 }
 0x6df   :  { %v1589_v38 = vmin.f32 %v1573_v14, 0.0  ;;  %v1590_v53 = vmin.f32 %v1574_v17, 0.0  ;;  %vm1581_vm0 = vcmp.gt.f32.partialorder %v1573_v14, 0.0  ;;  %vm1582_vm1 = vcmp.gt.f32.partialorder %v1574_v17, 0.0 }
 0x6e1   :  { %v1599_v54 = vmul.f32 1.442695, %v1589_v38  ;;  %v1601_v42 = vmul.f32 1.442695, %v1590_v53 }
 0x6e2   :  { %v1556_v29 = vpop.permute.xlu1 %1555 }
 0x6e3   :  { %2081 = vpow2.f32 %v1599_v54  ;;  %v1567_v13 = vadd.f32 %v1556_v29, %v1539_v27  ;;  %v1568_v31 = vadd.f32 %v1556_v29, %v1540_v2 }
 0x6e4   :  { %2083 = vpow2.f32 %v1601_v42 }
 0x6e5   :  { %v1575_v58 = vadd.f32 %v2099_v56, %v1567_v13  ;;  %v1576_v52 = vadd.f32 %v2100_v36, %v1568_v31 }
 0x6e7   :  { %v1591_v61 = vmin.f32 %v1575_v58, 0.0  ;;  %v1592_v44 = vmin.f32 %v1576_v52, 0.0  ;;  %vm1583_vm2 = vcmp.gt.f32.partialorder %v1575_v58, 0.0  ;;  %vm1584_vm3 = vcmp.gt.f32.partialorder %v1576_v52, 0.0 }
 0x6e9   :  { %v2082_v51 = vpop.eup %2081  ;;  %v1603_v12 = vmul.f32 1.442695, %v1591_v61  ;;  %v1605_v21 = vmul.f32 1.442695, %v1592_v44 }
 0x6ea   :  { %v2084_v39 = vpop.eup %2083  ;;  %v1693_v22 = vadd.f32 -1.0, %v2082_v51 }
 0x6eb   :  { %v1694_v32 = vadd.f32 -1.0, %v2084_v39  ;;  %2085 = vpow2.f32 %v1603_v12 }
 0x6ec   :  { %v1621_v50 = vmul.f32 1.6732632, %v1693_v22  ;;  %2087 = vpow2.f32 %v1605_v21 }
 0x6ed   :  { %v1622_v28 = vmul.f32 1.6732632, %v1694_v32 }
 0x6ee   :  { %v1629_v23 = vsel %vm1581_vm0, %v1573_v14, %v1621_v50 }
 0x6ef   :  { %v1630_v7 = vsel %vm1582_vm1, %v1574_v17, %v1622_v28  ;;  %v1637_v59 = vmul.f32 1.050701, %v1629_v23 }
 0x6f0   :  { %v1638_v55 = vmul.f32 1.050701, %v1630_v7 }
 0x6f1   :  { %v2086_v48 = vpop.eup %2085  ;;  %1645 = vst [vmem:[%s3193_s4 + $0x10] sm:$0xff] %v1637_v59 }
 0x6f2   :  { %v2088_v57 = vpop.eup %2087  ;;  %1646 = vst [vmem:[%s3193_s4 + $0x18] sm:$0xff] %v1638_v55  ;;  %v1695_v43 = vadd.f32 -1.0, %v2086_v48 }
 0x6f3   :  { %v1696_v3 = vadd.f32 -1.0, %v2088_v57 }
 0x6f4   :  { %v1623_v41 = vmul.f32 1.6732632, %v1695_v43 }
 0x6f5   :  { %v1624_v35 = vmul.f32 1.6732632, %v1696_v3 }
 0x6f6   :  { %v1631_v47 = vsel %vm1583_vm2, %v1575_v58, %v1623_v41 }
 0x6f7   :  { %v1632_v20 = vsel %vm1584_vm3, %v1576_v52, %v1624_v35  ;;  %v1639_v6 = vmul.f32 1.050701, %v1631_v47 }
 0x6f8   :  { %v1640_v30 = vmul.f32 1.050701, %v1632_v20 }
 0x6f9   :  { %1647 = vst [vmem:[%s3193_s4 + $0x20] sm:$0xff] %v1639_v6 }
 0x6fa   :  { %1648 = vst [vmem:[%s3193_s4 + $0x28] sm:$0xff] %v1640_v30 }

</bundles_post_ra>
